<compile_context>
chip_gen: v5e
topology: v5e:2x2
jax: 0.10.0
libtpu: 0.0.40
codegen_flags: <defaults>
</compile_context>

<pallas_src>
import functools

import jax
import jax.numpy as jnp
from jax import lax
from jax.experimental import pallas as pl
from jax.experimental.pallas import tpu as pltpu

BN_EPS = 1e-5
LANE = 128


def _round_up(x, m):
    return ((x + m - 1) // m) * m


def _compiler_params(n_axes):
    return pltpu.CompilerParams(
        dimension_semantics=("parallel",) * n_axes,   # v7x: use both TensorCores
        vmem_limit_bytes=32 * 1024 * 1024)            # fits every generation (<= v7x 64 MiB)


# ----------------------------------------------------------------------------
# In-kernel helpers (only lane-preserving broadcast / reshape / slice patterns)
# ----------------------------------------------------------------------------
def _upsample_nn(x, s):
    """Nearest-neighbour upsample (H, W, C) -> (H*s, W*s, C), all inside VMEM."""
    if s == 1:
        return x
    H, W, C = x.shape
    # repeat rows: (H, W, C) -> (H, s, W, C) -> (H*s, W, C)   (leading dims only)
    x = jnp.broadcast_to(x[:, None, :, :], (H, s, W, C)).reshape(H * s, W, C)
    # repeat cols: collapse, broadcast the new second-minor dim, re-split
    rows = H * s * W
    x = x.reshape(rows, C)
    x = jnp.broadcast_to(x[:, None, :], (rows, s, C)).reshape(rows * s, C)
    return x.reshape(H * s, W * s, C)


def _conv_acc(x_ref, w_ref, scale_factor):
    """3x3 SAME conv of the (padded, low-res) input tile.

    x_ref : (1, H+2, W+2, Cin)  zero-padded low-res tile (bf16)
    w_ref : (9*Cin, Cout)       taps flattened kh-major, kw, cin (bf16)
    Returns the f32 accumulator of shape (Ho*Wo, Cout), Ho = H*s, Wo = W*s.
    """
    _, Hp, Wp, Cin = x_ref.shape
    s = scale_factor
    H, W = Hp - 2, Wp - 2
    Ho, Wo = H * s, W * s

    xp = x_ref[0]                                     # (H+2, W+2, Cin)
    if s > 1:
        # Fused ResizeConv2d: upsample the padded tile in VMEM, then take a
        # 1-pixel zero border out of the s-pixel one (border rows are zeros).
        xp = _upsample_nn(xp, s)                      # ((H+2)s, (W+2)s, Cin)
        xp = xp[s - 1:s - 1 + Ho + 2, s - 1:s - 1 + Wo + 2, :]

    # im2col: one lane-dim concat -> single MXU matmul with K = 9*Cin.
    cols = []
    for kh in range(3):
        for kw in range(3):
            cols.append(xp[kh:kh + Ho, kw:kw + Wo, :].reshape(Ho * Wo, Cin))
    patch = jnp.concatenate(cols, axis=-1)            # (Ho*Wo, 9*Cin)
    acc = jnp.dot(patch, w_ref[...], preferred_element_type=jnp.float32)
    return acc, Ho, Wo


# ----------------------------------------------------------------------------
# Kernel 1: fused conv (+upsample) + scale/shift + residual + ReLU   (eval mode)
# ----------------------------------------------------------------------------
def _conv_fused_kernel(x_ref, w_ref, scale_ref, shift_ref, *rest,
                       scale_factor, apply_relu, has_residual, residual_padded):
    if has_residual:
        res_ref, out_ref = rest
    else:
        (out_ref,) = rest

    acc, Ho, Wo = _conv_acc(x_ref, w_ref, scale_factor)
    Cout = out_ref.shape[-1]

    y = acc * scale_ref[...] + shift_ref[...]                 # f32 epilogue
    if has_residual:
        r = res_ref[0]
        if residual_padded:
            r = r[1:Ho + 1, 1:Wo + 1, :]
        y = y + r.reshape(Ho * Wo, Cout).astype(jnp.float32)
    if apply_relu:
        y = jnp.maximum(y, 0.0)
    out_ref[...] = y.reshape(1, Ho, Wo, Cout).astype(out_ref.dtype)


# ----------------------------------------------------------------------------
# Kernel 2: main conv + shortcut conv + both folded BNs + add + ReLU
#           (eval-mode stride != 1; shortcut never touches HBM)
# ----------------------------------------------------------------------------
def _dual_conv_fused_kernel(a_ref, wa_ref, sa_ref, ha_ref,
                            b_ref, wb_ref, sb_ref, hb_ref, out_ref,
                            *, scale_factor, apply_relu):
    acc_a, Ho, Wo = _conv_acc(a_ref, wa_ref, scale_factor)
    acc_b, _, _ = _conv_acc(b_ref, wb_ref, scale_factor)
    Cout = out_ref.shape[-1]

    y = (acc_a * sa_ref[...] + ha_ref[...]) + (acc_b * sb_ref[...] + hb_ref[...])
    if apply_relu:
        y = jnp.maximum(y, 0.0)
    out_ref[...] = y.reshape(1, Ho, Wo, Cout).astype(out_ref.dtype)


# ----------------------------------------------------------------------------
# Kernel 3: conv (+upsample) + per-tile partial BN stats   (training pass 1)
# ----------------------------------------------------------------------------
def _conv_stats_kernel(x_ref, w_ref, z_ref, sum_ref, sq_ref, *, scale_factor):
    acc, Ho, Wo = _conv_acc(x_ref, w_ref, scale_factor)
    Cout = z_ref.shape[-1]
    z_ref[...] = acc.reshape(1, Ho, Wo, Cout).astype(z_ref.dtype)
    sum_ref[...] = jnp.sum(acc, axis=0, keepdims=True).reshape(1, 1, Cout)
    sq_ref[...] = jnp.sum(acc * acc, axis=0, keepdims=True).reshape(1, 1, Cout)


# ----------------------------------------------------------------------------
# Kernel 4: scale/shift + residual + ReLU epilogue          (training pass 2)
# ----------------------------------------------------------------------------
def _scale_shift_kernel(z_ref, scale_ref, shift_ref, *rest,
                        apply_relu, has_residual, residual_padded):
    if has_residual:
        res_ref, out_ref = rest
    else:
        (out_ref,) = rest
    _, Ho, Wo, Cout = out_ref.shape
    rows = Ho * Wo

    y = z_ref[0].reshape(rows, Cout) * scale_ref[...] + shift_ref[...]
    if has_residual:
        r = res_ref[0]
        if residual_padded:
            r = r[1:Ho + 1, 1:Wo + 1, :]
        y = y + r.reshape(rows, Cout).astype(jnp.float32)
    if apply_relu:
        y = jnp.maximum(y, 0.0)
    out_ref[...] = y.reshape(1, Ho, Wo, Cout).astype(out_ref.dtype)


# ----------------------------------------------------------------------------
# Kernel 5: dual scale/shift + add + ReLU epilogue (training pass 2, stride!=1)
# ----------------------------------------------------------------------------
def _dual_scale_shift_kernel(za_ref, sa_ref, ha_ref, zb_ref, sb_ref, hb_ref,
                             out_ref, *, apply_relu):
    _, Ho, Wo, Cout = out_ref.shape
    rows = Ho * Wo

    y = (za_ref[0].reshape(rows, Cout) * sa_ref[...] + ha_ref[...]
         + zb_ref[0].reshape(rows, Cout) * sb_ref[...] + hb_ref[...])
    if apply_relu:
        y = jnp.maximum(y, 0.0)
    out_ref[...] = y.reshape(1, Ho, Wo, Cout).astype(out_ref.dtype)


# ----------------------------------------------------------------------------
# pallas_call wrappers
# ----------------------------------------------------------------------------
def _conv_fused(x_pad, w, scale, shift, *, scale_factor, apply_relu,
                residual=None, residual_padded=False, out_dtype):
    N, Hp, Wp, Cin = x_pad.shape
    H, W = Hp - 2, Wp - 2
    K, Cout = w.shape
    Ho, Wo = H * scale_factor, W * scale_factor

    scale2 = scale.reshape(1, Cout).astype(jnp.float32)
    shift2 = shift.reshape(1, Cout).astype(jnp.float32)

    inputs = [x_pad, w, scale2, shift2]
    in_specs = [
        pl.BlockSpec((1, Hp, Wp, Cin), lambda n: (n, 0, 0, 0)),
        pl.BlockSpec((K, Cout), lambda n: (0, 0)),       # weights stay resident
        pl.BlockSpec((1, Cout), lambda n: (0, 0)),
        pl.BlockSpec((1, Cout), lambda n: (0, 0)),
    ]
    has_res = residual is not None
    if has_res:
        inputs.append(residual)
        rb = (1,) + residual.shape[1:]
        in_specs.append(pl.BlockSpec(rb, lambda n: (n, 0, 0, 0)))

    kernel = functools.partial(_conv_fused_kernel, scale_factor=scale_factor,
                               apply_relu=apply_relu, has_residual=has_res,
                               residual_padded=residual_padded)
    return pl.pallas_call(
        kernel,
        out_shape=jax.ShapeDtypeStruct((N, Ho, Wo, Cout), out_dtype),
        grid_spec=pltpu.PrefetchScalarGridSpec(
            num_scalar_prefetch=0, grid=(N,),
            in_specs=in_specs,
            out_specs=pl.BlockSpec((1, Ho, Wo, Cout), lambda n: (n, 0, 0, 0))),
        compiler_params=_compiler_params(1),
    )(*inputs)


def _dual_conv_fused(a_pad, wa, sca, sha, b_pad, wb, scb, shb, *,
                     scale_factor, apply_relu, out_dtype):
    N, Hp, Wp, Cin = a_pad.shape
    H, W = Hp - 2, Wp - 2
    K, Cout = wa.shape
    Ho, Wo = H * scale_factor, W * scale_factor

    sca2 = sca.reshape(1, Cout).astype(jnp.float32)
    sha2 = sha.reshape(1, Cout).astype(jnp.float32)
    scb2 = scb.reshape(1, Cout).astype(jnp.float32)
    shb2 = shb.reshape(1, Cout).astype(jnp.float32)

    in_specs = [
        pl.BlockSpec((1, Hp, Wp, Cin), lambda n: (n, 0, 0, 0)),
        pl.BlockSpec((K, Cout), lambda n: (0, 0)),
        pl.BlockSpec((1, Cout), lambda n: (0, 0)),
        pl.BlockSpec((1, Cout), lambda n: (0, 0)),
        pl.BlockSpec((1, Hp, Wp, Cin), lambda n: (n, 0, 0, 0)),
        pl.BlockSpec((K, Cout), lambda n: (0, 0)),
        pl.BlockSpec((1, Cout), lambda n: (0, 0)),
        pl.BlockSpec((1, Cout), lambda n: (0, 0)),
    ]
    kernel = functools.partial(_dual_conv_fused_kernel,
                               scale_factor=scale_factor, apply_relu=apply_relu)
    return pl.pallas_call(
        kernel,
        out_shape=jax.ShapeDtypeStruct((N, Ho, Wo, Cout), out_dtype),
        grid_spec=pltpu.PrefetchScalarGridSpec(
            num_scalar_prefetch=0, grid=(N,),
            in_specs=in_specs,
            out_specs=pl.BlockSpec((1, Ho, Wo, Cout), lambda n: (n, 0, 0, 0))),
        compiler_params=_compiler_params(1),
    )(a_pad, wa, sca2, sha2, b_pad, wb, scb2, shb2)


def _conv_pass1(x_pad, w, *, scale_factor):
    N, Hp, Wp, Cin = x_pad.shape
    H, W = Hp - 2, Wp - 2
    K, Cout = w.shape
    Ho, Wo = H * scale_factor, W * scale_factor

    kernel = functools.partial(_conv_stats_kernel, scale_factor=scale_factor)
    z, ssum, ssq = pl.pallas_call(
        kernel,
        out_shape=(jax.ShapeDtypeStruct((N, Ho, Wo, Cout), jnp.float32),
                   jax.ShapeDtypeStruct((N, 1, Cout), jnp.float32),
                   jax.ShapeDtypeStruct((N, 1, Cout), jnp.float32)),
        grid_spec=pltpu.PrefetchScalarGridSpec(
            num_scalar_prefetch=0, grid=(N,),
            in_specs=[pl.BlockSpec((1, Hp, Wp, Cin), lambda n: (n, 0, 0, 0)),
                      pl.BlockSpec((K, Cout), lambda n: (0, 0))],
            out_specs=(pl.BlockSpec((1, Ho, Wo, Cout), lambda n: (n, 0, 0, 0)),
                       pl.BlockSpec((1, 1, Cout), lambda n: (n, 0, 0)),
                       pl.BlockSpec((1, 1, Cout), lambda n: (n, 0, 0)))),
        compiler_params=_compiler_params(1),
    )(x_pad, w)
    return z, ssum, ssq


def _scale_shift(z, scale, shift, *, apply_relu, residual=None,
                 residual_padded=False, out_dtype):
    N, Ho, Wo, Cout = z.shape
    scale2 = scale.reshape(1, Cout).astype(jnp.float32)
    shift2 = shift.reshape(1, Cout).astype(jnp.float32)

    inputs = [z, scale2, shift2]
    in_specs = [pl.BlockSpec((1, Ho, Wo, Cout), lambda n: (n, 0, 0, 0)),
                pl.BlockSpec((1, Cout), lambda n: (0, 0)),
                pl.BlockSpec((1, Cout), lambda n: (0, 0))]
    has_res = residual is not None
    if has_res:
        inputs.append(residual)
        rb = (1,) + residual.shape[1:]
        in_specs.append(pl.BlockSpec(rb, lambda n: (n, 0, 0, 0)))

    kernel = functools.partial(_scale_shift_kernel, apply_relu=apply_relu,
                               has_residual=has_res,
                               residual_padded=residual_padded)
    return pl.pallas_call(
        kernel,
        out_shape=jax.ShapeDtypeStruct((N, Ho, Wo, Cout), out_dtype),
        grid_spec=pltpu.PrefetchScalarGridSpec(
            num_scalar_prefetch=0, grid=(N,),
            in_specs=in_specs,
            out_specs=pl.BlockSpec((1, Ho, Wo, Cout), lambda n: (n, 0, 0, 0))),
        compiler_params=_compiler_params(1),
    )(*inputs)


def _dual_scale_shift(za, sca, sha, zb, scb, shb, *, apply_relu, out_dtype):
    N, Ho, Wo, Cout = za.shape
    sca2 = sca.reshape(1, Cout).astype(jnp.float32)
    sha2 = sha.reshape(1, Cout).astype(jnp.float32)
    scb2 = scb.reshape(1, Cout).astype(jnp.float32)
    shb2 = shb.reshape(1, Cout).astype(jnp.float32)

    in_specs = [pl.BlockSpec((1, Ho, Wo, Cout), lambda n: (n, 0, 0, 0)),
                pl.BlockSpec((1, Cout), lambda n: (0, 0)),
                pl.BlockSpec((1, Cout), lambda n: (0, 0)),
                pl.BlockSpec((1, Ho, Wo, Cout), lambda n: (n, 0, 0, 0)),
                pl.BlockSpec((1, Cout), lambda n: (0, 0)),
                pl.BlockSpec((1, Cout), lambda n: (0, 0))]

    kernel = functools.partial(_dual_scale_shift_kernel, apply_relu=apply_relu)
    return pl.pallas_call(
        kernel,
        out_shape=jax.ShapeDtypeStruct((N, Ho, Wo, Cout), out_dtype),
        grid_spec=pltpu.PrefetchScalarGridSpec(
            num_scalar_prefetch=0, grid=(N,),
            in_specs=in_specs,
            out_specs=pl.BlockSpec((1, Ho, Wo, Cout), lambda n: (n, 0, 0, 0))),
        compiler_params=_compiler_params(1),
    )(za, sca2, sha2, zb, scb2, shb2)


# ----------------------------------------------------------------------------
# Parameter prep / BatchNorm folding (tiny (C,)-sized host-side JAX math)
# ----------------------------------------------------------------------------
def _prep_input(x_nchw, cin_p, dtype):
    # NCHW -> NHWC, lane-pad channels and add the 1-pixel conv halo in one
    # fused boundary copy (no separate HBM padding pass).
    x = jnp.transpose(x_nchw, (0, 2, 3, 1))
    N, H, W, C = x.shape
    x = jnp.pad(x, ((0, 0), (1, 1), (1, 1), (0, cin_p - C)))
    return x.astype(dtype)


def _prep_weight(w_oihw, cin_p, cout_p, dtype):
    # PyTorch (Cout, Cin, 3, 3) -> (9*Cin_p, Cout_p), taps kh-major / kw / cin.
    cout, cin = w_oihw.shape[0], w_oihw.shape[1]
    w = jnp.transpose(w_oihw, (2, 3, 1, 0))                       # (3,3,Cin,Cout)
    w = jnp.pad(w, ((0, 0), (0, 0), (0, cin_p - cin), (0, cout_p - cout)))
    return w.reshape(9 * cin_p, cout_p).astype(dtype)


def _pad_vec(v, target):
    return jnp.pad(v.astype(jnp.float32), (0, target - v.shape[0]))


def _eval_scale_shift(bn, conv_bias, cout_p):
    # Eval-mode BN (+ conv bias) folded to one scale/shift pair.
    scale = bn['gamma'] * lax.rsqrt(bn['running_var'] + BN_EPS)
    bias = conv_bias if conv_bias is not None else jnp.zeros_like(bn['beta'])
    shift = bn['beta'] + (bias - bn['running_mean']) * scale
    return _pad_vec(scale, cout_p), _pad_vec(shift, cout_p)


def _train_scale_shift(bn, ssum, ssq, count, cout_p):
    # Training-mode BN from per-tile partial sums (conv bias is skipped in the
    # conv pass: it is exactly cancelled by the batch-mean subtraction).
    total = jnp.sum(ssum, axis=(0, 1))
    total_sq = jnp.sum(ssq, axis=(0, 1))
    mean = total / count
    var = jnp.maximum(total_sq / count - mean * mean, 0.0)
    scale = _pad_vec(bn['gamma'], cout_p) * lax.rsqrt(var + BN_EPS)
    shift = _pad_vec(bn['beta'], cout_p) - mean * scale
    return scale, shift


# ----------------------------------------------------------------------------
# Synthetic parameters (deterministic)
# ----------------------------------------------------------------------------
def _bn_params(key, c):
    k1, k2, k3, k4 = jax.random.split(key, 4)
    return dict(
        gamma=jax.random.uniform(k1, (c,), jnp.float32, 0.5, 1.5),
        beta=jax.random.normal(k2, (c,), jnp.float32) * 0.1,
        running_mean=jax.random.normal(k3, (c,), jnp.float32) * 0.1,
        running_var=jax.random.uniform(k4, (c,), jnp.float32, 0.5, 1.5),
    )


def init_basic_block_dec(key, in_planes, stride=1):
    planes = int(in_planes / stride)
    ks = jax.random.split(key, 8)

    def conv_w(k, cout, cin):
        return jax.random.normal(k, (cout, cin, 3, 3), jnp.float32) * 0.1

    p = dict(
        stride=stride,
        w2=conv_w(ks[0], in_planes, in_planes),      # conv2 (bias=False)
        bn2=_bn_params(ks[1], in_planes),
        w1=conv_w(ks[2], planes, in_planes),         # conv1
        bn1=_bn_params(ks[3], planes),
    )
    if stride != 1:                                  # ResizeConv2d convs have bias
        p['b1'] = jax.random.normal(ks[4], (planes,), jnp.float32) * 0.1
        p['w_sc'] = conv_w(ks[5], planes, in_planes)
        p['b_sc'] = jax.random.normal(ks[6], (planes,), jnp.float32) * 0.1
        p['bn_sc'] = _bn_params(ks[7], planes)
    return p


# ----------------------------------------------------------------------------
# Public forward
# ----------------------------------------------------------------------------
def basic_block_dec(params, x_nchw, *, training=True, compute_dtype=jnp.bfloat16):
    stride = params['stride']
    N, cin, H, W = x_nchw.shape
    cout = params['w1'].shape[0]
    cin_p = _round_up(cin, LANE)
    cout_p = _round_up(cout, LANE)

    x_pad = _prep_input(x_nchw, cin_p, compute_dtype)            # (N, H+2, W+2, cin_p)
    w2 = _prep_weight(params['w2'], cin_p, cin_p, compute_dtype)
    w1 = _prep_weight(params['w1'], cin_p, cout_p, compute_dtype)
    w_sc = (_prep_weight(params['w_sc'], cin_p, cout_p, compute_dtype)
            if stride != 1 else None)

    if training:
        # -------- conv2 -> BN2(batch stats) -> ReLU  (two-pass BN) ----------
        z2, s2sum, s2sq = _conv_pass1(x_pad, w2, scale_factor=1)
        sc2, sh2 = _train_scale_shift(params['bn2'], s2sum, s2sq, N * H * W, cin_p)
        out = _scale_shift(z2, sc2, sh2, apply_relu=True, out_dtype=compute_dtype)
        out_pad = jnp.pad(out, ((0, 0), (1, 1), (1, 1), (0, 0)))

        if stride == 1:
            z1, s1sum, s1sq = _conv_pass1(out_pad, w1, scale_factor=1)
            sc1, sh1 = _train_scale_shift(params['bn1'], s1sum, s1sq, N * H * W, cout_p)
            y = _scale_shift(z1, sc1, sh1, apply_relu=True,
                             residual=x_pad, residual_padded=True,
                             out_dtype=jnp.float32)
        else:
            s = stride
            cnt = N * H * s * W * s
            # Pass 1: raw ResizeConv2d outputs + partial BN stats for both the
            # main branch and the shortcut branch (bias cancelled by batch mean).
            z1, s1sum, s1sq = _conv_pass1(out_pad, w1, scale_factor=s)
            zs, sssum, sssq = _conv_pass1(x_pad, w_sc, scale_factor=s)
            sc1, sh1 = _train_scale_shift(params['bn1'], s1sum, s1sq, cnt, cout_p)
            scs, shs = _train_scale_shift(params['bn_sc'], sssum, sssq, cnt, cout_p)
            # Pass 2: single fused epilogue (both BNs + add + ReLU); the f32
            # shortcut tensor is never materialised on its own in HBM.
            y = _dual_scale_shift(z1, sc1, sh1, zs, scs, shs,
                                  apply_relu=True, out_dtype=jnp.float32)
    else:
        # -------- eval mode: fully fused conv + folded BN (+res, +relu) -----
        sc2, sh2 = _eval_scale_shift(params['bn2'], None, cin_p)
        out = _conv_fused(x_pad, w2, sc2, sh2, scale_factor=1, apply_relu=True,
                          out_dtype=compute_dtype)
        out_pad = jnp.pad(out, ((0, 0), (1, 1), (1, 1), (0, 0)))

        if stride == 1:
            sc1, sh1 = _eval_scale_shift(params['bn1'], None, cout_p)
            y = _conv_fused(out_pad, w1, sc1, sh1, scale_factor=1, apply_relu=True,
                            residual=x_pad, residual_padded=True,
                            out_dtype=jnp.float32)
        else:
            s = stride
            sc1, sh1 = _eval_scale_shift(params['bn1'], params['b1'], cout_p)
            scs, shs = _eval_scale_shift(params['bn_sc'], params['b_sc'], cout_p)
            # Main ResizeConv2d + shortcut ResizeConv2d fused in ONE kernel:
            # both matmuls, both folded BNs, add, ReLU — no f32 shortcut HBM
            # round-trip.
            y = _dual_conv_fused(out_pad, w1, sc1, sh1,
                                 x_pad, w_sc, scs, shs,
                                 scale_factor=s, apply_relu=True,
                                 out_dtype=jnp.float32)

    y = y[..., :cout]                                 # drop lane padding
    return jnp.transpose(y, (0, 3, 1, 2))             # NHWC -> NCHW


# ----------------------------------------------------------------------------
# Pure-JAX reference (lax.conv) with matching bf16 input quantization
# ----------------------------------------------------------------------------
def _nearest_up(x_nhwc, s):
    return jnp.repeat(jnp.repeat(x_nhwc, s, axis=1), s, axis=2)


def _ref_conv(x_nhwc, w_oihw, bias=None, dtype=jnp.bfloat16):
    w_hwio = jnp.transpose(w_oihw, (2, 3, 1, 0)).astype(dtype)
    y = lax.conv_general_dilated(x_nhwc.astype(dtype), w_hwio, (1, 1), 'SAME',
                                 dimension_numbers=('NHWC', 'HWIO', 'NHWC'),
                                 preferred_element_type=jnp.float32)
    if bias is not None:
        y = y + bias
    return y


def _ref_bn(x, bn, training):
    if training:
        m = jnp.mean(x, axis=(0, 1, 2))
        v = jnp.mean((x - m) ** 2, axis=(0, 1, 2))
    else:
        m, v = bn['running_mean'], bn['running_var']
    return (x - m) / jnp.sqrt(v + BN_EPS) * bn['gamma'] + bn['beta']


def basic_block_dec_ref(params, x_nchw, *, training=True, compute_dtype=jnp.bfloat16):
    stride = params['stride']
    x = jnp.transpose(x_nchw, (0, 2, 3, 1))
    x = x.astype(compute_dtype).astype(jnp.float32)   # same input quantization as the kernels
    out = jax.nn.relu(_ref_bn(_ref_conv(x, params['w2'], dtype=compute_dtype),
                              params['bn2'], training))
    if stride == 1:
        out = _ref_bn(_ref_conv(out, params['w1'], dtype=compute_dtype),
                      params['bn1'], training)
        out = out + x
    else:
        out = _ref_bn(_ref_conv(_nearest_up(out, stride), params['w1'],
                                bias=params['b1'], dtype=compute_dtype),
                      params['bn1'], training)
        sc = _ref_bn(_ref_conv(_nearest_up(x, stride), params['w_sc'],
                               bias=params['b_sc'], dtype=compute_dtype),
                     params['bn_sc'], training)
        out = out + sc
    out = jax.nn.relu(out)
    return jnp.transpose(out, (0, 3, 1, 2))


# ----------------------------------------------------------------------------
if __name__ == "__main__":
    key = jax.random.PRNGKey(0)
    kx1, kp1, kx2, kp2 = jax.random.split(key, 4)
    TOL = dict(atol=5e-3, rtol=5e-3)   # bf16 MXU operands, f32 accumulation

    # stride = 1 (identity shortcut): training-mode BN (two-pass) and eval-mode
    x1 = jax.random.normal(kx1, (2, 8, 16, 16), jnp.float32)    # NCHW
    p1 = init_basic_block_dec(kp1, in_planes=8, stride=1)

    y1 = jax.block_until_ready(basic_block_dec(p1, x1, training=True))
    r1 = basic_block_dec_ref(p1, x1, training=True)
    assert y1.shape == (2, 8, 16, 16)
    assert jnp.allclose(y1, r1, **TOL), float(jnp.abs(y1 - r1).max())

    y1e = jax.block_until_ready(basic_block_dec(p1, x1, training=False))
    r1e = basic_block_dec_ref(p1, x1, training=False)
    assert jnp.allclose(y1e, r1e, **TOL), float(jnp.abs(y1e - r1e).max())

    # stride = 2 (ResizeConv2d: fused in-kernel nearest upsample + conv/BN,
    # main branch + shortcut branch fused into a single dual-conv kernel)
    x2 = jax.random.normal(kx2, (2, 8, 8, 8), jnp.float32)      # NCHW
    p2 = init_basic_block_dec(kp2, in_planes=8, stride=2)

    y2 = jax.block_until_ready(basic_block_dec(p2, x2, training=True))
    r2 = basic_block_dec_ref(p2, x2, training=True)
    assert y2.shape == (2, 4, 16, 16)
    assert jnp.allclose(y2, r2, **TOL), float(jnp.abs(y2 - r2).max())

    y2e = jax.block_until_ready(basic_block_dec(p2, x2, training=False))
    r2e = basic_block_dec_ref(p2, x2, training=False)
    assert jnp.allclose(y2e, r2e, **TOL), float(jnp.abs(y2e - r2e).max())

    print("KERNEL_OK")
</pallas_src>

<mosaic_0001>
module attributes {stable_mosaic.version = 11 : i64} {
  func.func @_conv_stats_kernel(%arg0: i32, %arg1: memref<1x18x18x128xbf16, #tpu.memory_space<vmem>>, %arg2: memref<1152x128xbf16, #tpu.memory_space<vmem>>, %arg3: memref<1x16x16x128xf32, #tpu.memory_space<vmem>>, %arg4: memref<1x1x128xf32, #tpu.memory_space<vmem>>, %arg5: memref<1x1x128xf32, #tpu.memory_space<vmem>>) attributes {dimension_semantics = [#tpu.dimension_semantics<parallel>], iteration_bounds = array<i64: 2>, scalar_prefetch = 0 : i64, scratch_operands = 0 : i64, tpu.core_type = #tpu.core_type<tc>, window_params = [{transform_indices = @transform_0, window_bounds = array<i64: 1, 18, 18, 128>}, {pipeline_mode = #tpu.pipeline_mode<synchronous>, transform_indices = @transform_1, window_bounds = array<i64: 1152, 128>}, {transform_indices = @transform_2, window_bounds = array<i64: 1, 16, 16, 128>}, {transform_indices = @transform_3, window_bounds = array<i64: 1, 1, 128>}, {transform_indices = @transform_4, window_bounds = array<i64: 1, 1, 128>}]} {
    %c0 = arith.constant 0 : index
    %c0_0 = arith.constant 0 : index
    %c0_1 = arith.constant 0 : index
    %c0_2 = arith.constant 0 : index
    %0 = vector.load %arg1[%c0, %c0_0, %c0_1, %c0_2] : memref<1x18x18x128xbf16, #tpu.memory_space<vmem>>, vector<1x18x18x128xbf16>
    %1 = vector.shape_cast %0 : vector<1x18x18x128xbf16> to vector<18x18x128xbf16>
    %2 = vector.extract_strided_slice %1 {offsets = [0, 0, 0], sizes = [16, 16, 128], strides = [1, 1, 1]} : vector<18x18x128xbf16> to vector<16x16x128xbf16>
    %3 = vector.shape_cast %2 : vector<16x16x128xbf16> to vector<256x128xbf16>
    %4 = vector.extract_strided_slice %1 {offsets = [0, 1, 0], sizes = [16, 16, 128], strides = [1, 1, 1]} : vector<18x18x128xbf16> to vector<16x16x128xbf16>
    %5 = vector.shape_cast %4 : vector<16x16x128xbf16> to vector<256x128xbf16>
    %6 = vector.extract_strided_slice %1 {offsets = [0, 2, 0], sizes = [16, 16, 128], strides = [1, 1, 1]} : vector<18x18x128xbf16> to vector<16x16x128xbf16>
    %7 = vector.shape_cast %6 : vector<16x16x128xbf16> to vector<256x128xbf16>
    %8 = vector.extract_strided_slice %1 {offsets = [1, 0, 0], sizes = [16, 16, 128], strides = [1, 1, 1]} : vector<18x18x128xbf16> to vector<16x16x128xbf16>
    %9 = vector.shape_cast %8 : vector<16x16x128xbf16> to vector<256x128xbf16>
    %10 = vector.extract_strided_slice %1 {offsets = [1, 1, 0], sizes = [16, 16, 128], strides = [1, 1, 1]} : vector<18x18x128xbf16> to vector<16x16x128xbf16>
    %11 = vector.shape_cast %10 : vector<16x16x128xbf16> to vector<256x128xbf16>
    %12 = vector.extract_strided_slice %1 {offsets = [1, 2, 0], sizes = [16, 16, 128], strides = [1, 1, 1]} : vector<18x18x128xbf16> to vector<16x16x128xbf16>
    %13 = vector.shape_cast %12 : vector<16x16x128xbf16> to vector<256x128xbf16>
    %14 = vector.extract_strided_slice %1 {offsets = [2, 0, 0], sizes = [16, 16, 128], strides = [1, 1, 1]} : vector<18x18x128xbf16> to vector<16x16x128xbf16>
    %15 = vector.shape_cast %14 : vector<16x16x128xbf16> to vector<256x128xbf16>
    %16 = vector.extract_strided_slice %1 {offsets = [2, 1, 0], sizes = [16, 16, 128], strides = [1, 1, 1]} : vector<18x18x128xbf16> to vector<16x16x128xbf16>
    %17 = vector.shape_cast %16 : vector<16x16x128xbf16> to vector<256x128xbf16>
    %18 = vector.extract_strided_slice %1 {offsets = [2, 2, 0], sizes = [16, 16, 128], strides = [1, 1, 1]} : vector<18x18x128xbf16> to vector<16x16x128xbf16>
    %19 = vector.shape_cast %18 : vector<16x16x128xbf16> to vector<256x128xbf16>
    %20 = tpu.concatenate %3, %5, %7, %9, %11, %13, %15, %17, %19 in 1 : vector<256x128xbf16>, vector<256x128xbf16>, vector<256x128xbf16>, vector<256x128xbf16>, vector<256x128xbf16>, vector<256x128xbf16>, vector<256x128xbf16>, vector<256x128xbf16>, vector<256x128xbf16> -> vector<256x1152xbf16>
    %c0_3 = arith.constant 0 : index
    %c0_4 = arith.constant 0 : index
    %21 = vector.load %arg2[%c0_3, %c0_4] : memref<1152x128xbf16, #tpu.memory_space<vmem>>, vector<1152x128xbf16>
    %cst = arith.constant dense<0.000000e+00> : vector<256x128xf32>
    %22 = tpu.matmul %20, %21, %cst {dimension_numbers = #tpu.dot_dimension_numbers<[1], [0], [0], [1], [0, 0, 1, 1], [], []>} : vector<256x1152xbf16>, vector<1152x128xbf16>, vector<256x128xf32> -> vector<256x128xf32>
    %23 = vector.shape_cast %22 : vector<256x128xf32> to vector<1x16x16x128xf32>
    %c0_5 = arith.constant 0 : index
    %c0_6 = arith.constant 0 : index
    %c0_7 = arith.constant 0 : index
    %c0_8 = arith.constant 0 : index
    %24 = vector.load %arg3[%c0_5, %c0_6, %c0_7, %c0_8] : memref<1x16x16x128xf32, #tpu.memory_space<vmem>>, vector<1x16x16x128xf32>
    tpu.vector_store %arg3[%c0_5, %c0_6, %c0_7, %c0_8], %23 {strides = array<i32>} : memref<1x16x16x128xf32, #tpu.memory_space<vmem>>, vector<1x16x16x128xf32>,
    %cst_9 = arith.constant dense<0.000000e+00> : vector<128xf32>
    %25 = vector.multi_reduction <add>, %22, %cst_9 [0] : vector<256x128xf32> to vector<128xf32>
    %26 = vector.shape_cast %25 : vector<128xf32> to vector<1x128xf32>
    %27 = vector.shape_cast %26 : vector<1x128xf32> to vector<1x1x128xf32>
    %c0_10 = arith.constant 0 : index
    %c0_11 = arith.constant 0 : index
    %c0_12 = arith.constant 0 : index
    %28 = vector.load %arg4[%c0_10, %c0_11, %c0_12] : memref<1x1x128xf32, #tpu.memory_space<vmem>>, vector<1x1x128xf32>
    tpu.vector_store %arg4[%c0_10, %c0_11, %c0_12], %27 {strides = array<i32>} : memref<1x1x128xf32, #tpu.memory_space<vmem>>, vector<1x1x128xf32>,
    %29 = arith.mulf %22, %22 : vector<256x128xf32>
    %cst_13 = arith.constant dense<0.000000e+00> : vector<128xf32>
    %30 = vector.multi_reduction <add>, %29, %cst_13 [0] : vector<256x128xf32> to vector<128xf32>
    %31 = vector.shape_cast %30 : vector<128xf32> to vector<1x128xf32>
    %32 = vector.shape_cast %31 : vector<1x128xf32> to vector<1x1x128xf32>
    %c0_14 = arith.constant 0 : index
    %c0_15 = arith.constant 0 : index
    %c0_16 = arith.constant 0 : index
    %33 = vector.load %arg5[%c0_14, %c0_15, %c0_16] : memref<1x1x128xf32, #tpu.memory_space<vmem>>, vector<1x1x128xf32>
    tpu.vector_store %arg5[%c0_14, %c0_15, %c0_16], %32 {strides = array<i32>} : memref<1x1x128xf32, #tpu.memory_space<vmem>>, vector<1x1x128xf32>,
    return
  }
  func.func @transform_0(%arg0: i32) -> (i32, i32, i32, i32) {
    %c0_i32 = arith.constant 0 : i32
    %c0_i32_0 = arith.constant 0 : i32
    %c0_i32_1 = arith.constant 0 : i32
    %c0_i32_2 = arith.constant 0 : i32
    return %arg0, %c0_i32, %c0_i32_0, %c0_i32_1 : i32, i32, i32, i32
  }
  func.func @transform_1(%arg0: i32) -> (i32, i32) {
    %c0_i32 = arith.constant 0 : i32
    %c0_i32_0 = arith.constant 0 : i32
    %c0_i32_1 = arith.constant 0 : i32
    return %c0_i32, %c0_i32_0 : i32, i32
  }
  func.func @transform_2(%arg0: i32) -> (i32, i32, i32, i32) {
    %c0_i32 = arith.constant 0 : i32
    %c0_i32_0 = arith.constant 0 : i32
    %c0_i32_1 = arith.constant 0 : i32
    %c0_i32_2 = arith.constant 0 : i32
    return %arg0, %c0_i32, %c0_i32_0, %c0_i32_1 : i32, i32, i32, i32
  }
  func.func @transform_3(%arg0: i32) -> (i32, i32, i32) {
    %c0_i32 = arith.constant 0 : i32
    %c0_i32_0 = arith.constant 0 : i32
    %c0_i32_1 = arith.constant 0 : i32
    return %arg0, %c0_i32, %c0_i32_0 : i32, i32, i32
  }
  func.func @transform_4(%arg0: i32) -> (i32, i32, i32) {
    %c0_i32 = arith.constant 0 : i32
    %c0_i32_0 = arith.constant 0 : i32
    %c0_i32_1 = arith.constant 0 : i32
    return %arg0, %c0_i32, %c0_i32_0 : i32, i32, i32
  }
}

</mosaic_0001>

<bundles_post_ra>
// kernel: tpu_custom_call.1
= control target key start
LH: loop header
LB: loop body
LE: loop exit
PB: predicated region body
PF: predicated region fallthrough
CT: control target
= control target key end

     0   :  { %10 = vsyncpa [#allocation3], 0  ;;  %s4780_s0 = inlined_call_operand.vmem [shape: bf16[2,18,18,128], index: 0, kind: input, shape index: {}]   ;;  %s4781_s1 = inlined_call_operand.vmem [shape: bf16[1152,128], index: 1, kind: input, shape index: {}]   ;;  %s4782_s2 = inlined_call_operand.hbm [shape: f32[2,16,16,128], index: 2, kind: output, shape index: {0}]   ;;  %s4783_s3 = inlined_call_operand.hbm [shape: f32[2,1,128], index: 3, kind: output, shape index: {1}]   ;;  %s4784_s4 = inlined_call_operand.hbm [shape: f32[2,1,128], index: 4, kind: output, shape index: {2}]  }
   0x1   :  { %12 = vsyncpa [#allocation3 + $0x1], 0 }
   0x2   :  { %13 = vsyncpa [#allocation5], 0 }
   0x3   :  { %15 = vsyncpa [#allocation5 + $0x1], 0  ;;  %s3503_s15 = smov 0   ;;  %s3505_s16 = smov 0  }
   0x4   :  { %s3507_s17 = smov 0   ;;  %s3509_s18 = smov 0  }
   0x5 LB: > { %s3524_s19 = sadd.s32 4294967295, %s3474_s18   ;;  %s2782_s20 = sadd.s32 4294967294, %s3474_s18   ;;  %s3474_s18 = sphi %s3509_s18, %s4876_s18   ;;  %s3470_s17 = sphi %s3507_s17, %s4875_s17   ;;  %s3466_s16 = sphi %s3505_s16, %s4874_s16   ;;  %s3462_s15 = sphi %s3503_s15, %s4873_s15  }
   0x6   : > { %s3528_s21 = sadd.s32 1, %s3474_s18   ;;  %s75_s22 = sadd.s32 1, %s3470_s17 }
   0x7   : > { %s72_s23 = ssub.s32 %s3474_s18, %s3528_s21  ;;  %p85_p0 = scmp.ne.s32.totalorder %s3470_s17, %s3466_s16 }
   0x8   : > { %p73_p1 = scmp.eq.s32.totalorder %s72_s23, 0  ;;  %p86_p2 = scmp.eq.s32.totalorder %s3524_s19, 1 }
   0x9   : > { %p91_p3 = scmp.ne.s32.totalorder %s3466_s16, %s3462_s15  ;;  %p92_p4 = scmp.eq.s32.totalorder %s2782_s20, 1 }
   0xa   : > { %s3541_s24 = scalar_select %p73_p1, %s3470_s17, %s75_s22  }
   0xb   : > { %p3543_p5 = por %p86_p2, %p85_p0  ;;  %p3547_p6 = por %p92_p4, %p91_p3 }
   0xc   : > { %p2785_p7 = scmp.ge.s32.totalorder %s3474_s18, 1  ;;  %p173_p8 = scmp.lt.s32.totalorder %s3474_s18, 3 }
   0xe   : > { %p174_p9 = pnand %p2785_p7, %p173_p8 }
  0x10   : > { %177 = sbr.rel (%p174_p9) target bundleno = 792 (0x318), region = 28 }
  0x15   : > { %v3196_v0 = vld [vmem:[%s4781_s1 + $0x38] sm:$0xff]  ;;  %v3195_v1 = vld [vmem:[%s4781_s1 + $0x30] sm:$0xff]  ;;  %v3194_v2 = vld [vmem:[%s4781_s1 + $0x28] sm:$0xff]  ;;  %p207_p10 = scmp.lt.s32.totalorder %s3524_s19, 1  ;;  %vm266_vm0 = vsmask.f32 3328 }
  0x16   : > { %3262 = vmatpush.bf16.msra.mxu1 %v3196_v0  ;;  %3263 = vmatpush.bf16.msra.mxu2 %v3196_v0  ;;  %v3193_v3 = vld [vmem:[%s4781_s1 + $0x20] sm:$0xff]  ;;  %v3192_v4 = vld [vmem:[%s4781_s1 + $0x18] sm:$0xff]  ;;  %v3191_v5 = vld [vmem:[%s4781_s1 + $0x10] sm:$0xff]  ;;  %vm267_vm1 = vsmask.f32 7440  ;;  %vm701_vm2 = vcmask 1042432  }
  0x17   : > { %3264 = vmatpush.bf16.msra.mxu3 %v3196_v0  ;;  %1676 = vmatpush.bf16.msra.mxu0 %v3196_v0  ;;  %s208_s13 = scalar_select %p207_p10, %s3524_s19, 1  ;;  %v3190_v6 = vld [vmem:[%s4781_s1 + $0x8] sm:$0xff]  ;;  %v3189_v7 = vld [vmem:[%s4781_s1] sm:$0xff]  ;;  %v3212_v8 = vld [vmem:[%s4781_s1 + $0xb8] sm:$0xff]  ;;  %vm702_vm3 = vcmask 1046532  }
  0x18   : > { %v3220_v9 = vld [vmem:[%s4781_s1 + $0xf8] sm:$0xff]  ;;  %v3211_v16 = vld [vmem:[%s4781_s1 + $0xb0] sm:$0xff]  ;;  %v3210_v20 = vld [vmem:[%s4781_s1 + $0xa8] sm:$0xff]  ;;  %s4575_s14 = sand.u32 1, %s3466_s16   ;;  %s3372_s12 = scalar_lea.hbm %s4782_s2, 512 }
  0x19   : > { %s3286_s23 = smul.u32 216, %s208_s13  ;;  %v3204_v14 = vld [vmem:[%s4781_s1 + $0x78] sm:$0xff]  ;;  %v3219_v17 = vld [vmem:[%s4781_s1 + $0xf0] sm:$0xff]  ;;  %v3218_v21 = vld [vmem:[%s4781_s1 + $0xe8] sm:$0xff]  ;;  %s2786_s22 = sshll.u32 %s4575_s14, 8 }
  0x1a   : > { %3265 = vmatpush.bf16.msra.mxu1 %v3195_v1  ;;  %3266 = vmatpush.bf16.msra.mxu2 %v3195_v1  ;;  %v3228_v15 = vld [vmem:[%s4781_s1 + $0x138] sm:$0xff]  ;;  %v3203_v18 = vld [vmem:[%s4781_s1 + $0x70] sm:$0xff]  ;;  %v3202_v22 = vld [vmem:[%s4781_s1 + $0x68] sm:$0xff]  ;;  %s2618_s7 = scalar_lea.sflag [#allocation3], %s4575_s14 }
  0x1b   : > { %3267 = vmatpush.bf16.msra.mxu3 %v3195_v1  ;;  %1677 = vmatpush.bf16.msra.mxu0 %v3195_v1  ;;  %s3582_s5 = scalar_lea.vmem %s4780_s0, %s3286_s23  ;;  %v3227_v19 = vld [vmem:[%s4781_s1 + $0x130] sm:$0xff]  ;;  %v3226_v23 = vld [vmem:[%s4781_s1 + $0x128] sm:$0xff]  ;;  %v3209_v24 = vld [vmem:[%s4781_s1 + $0xa0] sm:$0xff]  ;;  %s4579_s23 = scalar_lea.vmem [#allocation2], %s2786_s22 }
  0x1c   : > { %v3591_v10 = vld [vmem:[%s3582_s5 + $0x30] sm:$0xff]  ;;  %v3594_v11 = vld [vmem:[%s3582_s5 + $0x60] sm:$0xff]  ;;  %v3208_v28 = vld [vmem:[%s4781_s1 + $0x98] sm:$0xff]  ;;  %s2638_s30 = sshll.u32 %s4579_s23, 4  ;;  %s2639_s30 = int_to_ptr.vmem [resolvable:$true] %s2638_s30 }
  0x1d   : > { %v3183_v12 = vld [vmem:[%s3582_s5 + $0x90] sm:$0xff]  ;;  %v3171_v13 = vld [vmem:[%s3582_s5] sm:$0xff]  ;;  %v3216_v29 = vld [vmem:[%s4781_s1 + $0xd8] sm:$0xff] }
  0x1e   : > { %3268 = vmatpush.bf16.msra.mxu1 %v3194_v2  ;;  %3269 = vmatpush.bf16.msra.mxu2 %v3194_v2  ;;  %v3217_v25 = vld [vmem:[%s4781_s1 + $0xe0] sm:$0xff]  ;;  %v3652_v31 = vld [vmem:[%s3582_s5 + $0x6c] sm:$0xff]  ;;  %v3200_v34 = vld [vmem:[%s4781_s1 + $0x58] sm:$0xff] }
  0x1f   : > { %3270 = vmatpush.bf16.msra.mxu3 %v3194_v2  ;;  %1678 = vmatpush.bf16.msra.mxu0 %v3194_v2  ;;  %v3201_v26 = vld [vmem:[%s4781_s1 + $0x60] sm:$0xff]  ;;  %v3656_v33 = vld [vmem:[%s3582_s5 + $0xc] sm:$0xff]  ;;  %v3224_v35 = vld [vmem:[%s4781_s1 + $0x118] sm:$0xff] }
  0x20   : > { %v3225_v27 = vld [vmem:[%s4781_s1 + $0x120] sm:$0xff]  ;;  %v3207_v36 = vld [vmem:[%s4781_s1 + $0x90] sm:$0xff]  ;;  %v3206_v40 = vld [vmem:[%s4781_s1 + $0x88] sm:$0xff] }
  0x21   : > { %v3649_v30 = vld [vmem:[%s3582_s5 + $0x3c] sm:$0xff]  ;;  %v3215_v37 = vld [vmem:[%s4781_s1 + $0xd0] sm:$0xff]  ;;  %v3214_v41 = vld [vmem:[%s4781_s1 + $0xc8] sm:$0xff] }
  0x22   : > { %3271 = vmatpush.bf16.msra.mxu1 %v3193_v3  ;;  %3272 = vmatpush.bf16.msra.mxu2 %v3193_v3  ;;  %v3184_v32 = vld [vmem:[%s3582_s5 + $0x9c] sm:$0xff]  ;;  %v3199_v38 = vld [vmem:[%s4781_s1 + $0x50] sm:$0xff]  ;;  %v3198_v42 = vld [vmem:[%s4781_s1 + $0x48] sm:$0xff] }
  0x23   : > { %3273 = vmatpush.bf16.msra.mxu3 %v3193_v3  ;;  %1679 = vmatpush.bf16.msra.mxu0 %v3193_v3  ;;  %v3223_v39 = vld [vmem:[%s4781_s1 + $0x110] sm:$0xff]  ;;  %v3222_v43 = vld [vmem:[%s4781_s1 + $0x108] sm:$0xff]  ;;  %v3205_v44 = vld [vmem:[%s4781_s1 + $0x80] sm:$0xff] }
  0x24   : > { %v3213_v45 = vld [vmem:[%s4781_s1 + $0xc0] sm:$0xff]  ;;  %v3704_v48 = vld [vmem:[%s3582_s5 + $0x48] sm:$0xff]  ;;  %v3181_v49 = vld [vmem:[%s3582_s5 + $0x78] sm:$0xff] }
  0x25   : > { %v3197_v46 = vld [vmem:[%s4781_s1 + $0x40] sm:$0xff]  ;;  %v3185_v50 = vld [vmem:[%s3582_s5 + $0xa8] sm:$0xff]  ;;  %v3709_v51 = vld [vmem:[%s3582_s5 + $0x18] sm:$0xff] }
  0x26   : > { %3274 = vmatpush.bf16.msra.mxu1 %v3192_v4  ;;  %3275 = vmatpush.bf16.msra.mxu2 %v3192_v4  ;;  %v3221_v47 = vld [vmem:[%s4781_s1 + $0x100] sm:$0xff]  ;;  %v3244_v54 = vld [vmem:[%s4781_s1 + $0x1b8] sm:$0xff]  ;;  %v3736_v62 = vld [vmem:[%s3582_s5 + $0xc] sm:$0xf] }
  0x27   : > { %3276 = vmatpush.bf16.msra.mxu3 %v3192_v4  ;;  %1680 = vmatpush.bf16.msra.mxu0 %v3192_v4  ;;  %v3712_v52 = vld [vmem:[%s3582_s5] sm:$0xf]  ;;  %v3716_v53 = vld [vmem:[%s3582_s5 + $0x4] sm:$0xf]  ;;  %v3252_v55 = vld [vmem:[%s4781_s1 + $0x1f8] sm:$0xff]  ;;  %v294_v1 = vshrl.u32 %v3736_v62, 16 }
  0x28   : > { %v3236_v56 = vld [vmem:[%s4781_s1 + $0x178] sm:$0xff]  ;;  %v270_v57 = vshrl.u32 %v3712_v52, 16  ;;  %v273_v58 = vshll.u32 %v3712_v52, 16  ;;  %v279_v60 = vshll.u32 %v3716_v53, 16  ;;  %v283_v61 = vshrl.u32 %v3716_v53, 16  ;;  %vm3760_vm4 = vmor %vm266_vm0, %vm267_vm1 }
  0x29   : > { %v3260_v59 = vld [vmem:[%s4781_s1 + $0x238] sm:$0xff]  ;;  %v3739_v63 = vld [vmem:[%s3582_s5 + $0x10] sm:$0xf]  ;;  %v214_v0 = vld [vmem:[%s3582_s5 + $0x8] sm:$0x1]  ;;  %v297_v2 = vshll.u32 %v3736_v62, 16 }
  0x2a   : > { %3277 = vmatpush.bf16.msra.mxu1 %v3191_v5  ;;  %3278 = vmatpush.bf16.msra.mxu2 %v3191_v5  ;;  %v303_v3 = vshll.u32 %v3739_v63, 16  ;;  %v307_v4 = vshrl.u32 %v3739_v63, 16  ;;  %vm3765_vm5 = vmor %vm701_vm2, %vm702_vm3 }
  0x2b   : > { %3279 = vmatpush.bf16.msra.mxu3 %v3191_v5  ;;  %1681 = vmatpush.bf16.msra.mxu0 %v3191_v5  ;;  %v272_v5 = vrot.slane %v270_v57, 4 }
  0x2e   : > { %3280 = vmatpush.bf16.msra.mxu1 %v3190_v6  ;;  %3281 = vmatpush.bf16.msra.mxu2 %v3190_v6 }
  0x2f   : > { %3282 = vmatpush.bf16.msra.mxu3 %v3190_v6  ;;  %1682 = vmatpush.bf16.msra.mxu0 %v3190_v6  ;;  %v275_v6 = vrot.slane %v273_v58, 5 }
  0x32   : > { %3283 = vmatpush.bf16.msra.mxu1 %v3189_v7  ;;  %3284 = vmatpush.bf16.msra.mxu2 %v3189_v7 }
  0x33   : > { %3285 = vmatpush.bf16.msra.mxu3 %v3189_v7  ;;  %1683 = vmatpush.bf16.msra.mxu0 %v3189_v7  ;;  %v281_v7 = vrot.slane %v279_v60, 5 }
  0x35   : > { %1704 = vmatmul.bf16.vlgmr.msra.gmra.mxu1 %v3591_v10  ;;  %1724 = vmatmul.bf16.vlgmr.msra.gmra.mxu2 %v3594_v11 }
  0x36   : > { %1854 = vmatpush.bf16.msrb.mxu2 %v3212_v8  ;;  %1744 = vmatmul.bf16.vlgmr.msra.gmra.mxu3 %v3183_v12  ;;  %v285_v8 = vrot.slane %v283_v61, 4  ;;  %v296_v12 = vrot.slane %v294_v1, 4 }
  0x37   : > { %1943 = vmatpush.bf16.msrb.mxu3 %v3220_v9  ;;  %1684 = vmatmul.bf16.vlgmr.msra.gmra.mxu0 %v3171_v13  ;;  %v289_v9 = vshll.u32 %v214_v0, 16  ;;  %v299_v13 = vrot.slane %v297_v2, 5 }
  0x38   : > { %1765 = vmatpush.bf16.msrb.mxu1 %v3204_v14  ;;  %2032 = vmatpush.bf16.msrb.mxu0 %v3228_v15  ;;  %v305_v14 = vrot.slane %v303_v3, 5  ;;  %v309_v15 = vrot.slane %v307_v4, 4  ;;  %v3793_v3 = vld [vmem:[%s3582_s5 + $0x20] sm:$0x1] }
  0x3a   : > { %1855 = vmatpush.bf16.msrb.mxu2 %v3211_v16  ;;  %v276_v16 = vor.u32 %v275_v6, %v272_v5  ;;  %v713_v5 = vrot.slane %v3739_v63, 5  ;;  %v3243_v63 = vld [vmem:[%s4781_s1 + $0x1b0] sm:$0xff] }
  0x3b   : > { %1944 = vmatpush.bf16.msrb.mxu3 %v3219_v17  ;;  %v286_v17 = vor.u32 %v285_v8, %v281_v7 }
  0x3c   : > { %1766 = vmatpush.bf16.msrb.mxu1 %v3203_v18  ;;  %2033 = vmatpush.bf16.msrb.mxu0 %v3227_v19  ;;  %v706_v18 = vrot.slane %v3716_v53, 5  ;;  %v3748_v19 = vld [vmem:[%s3582_s5 + $0x14] sm:$0x1] }
  0x3e   : > { %1856 = vmatpush.bf16.msrb.mxu2 %v3210_v20  ;;  %v3751_v20 = vld [vmem:[%s3582_s5 + $0x54] sm:$0xff] }
  0x3f   : > { %1945 = vmatpush.bf16.msrb.mxu3 %v3218_v21  ;;  %v3182_v21 = vld [vmem:[%s3582_s5 + $0x84] sm:$0xff] }
  0x40   : > { %1767 = vmatpush.bf16.msrb.mxu1 %v3202_v22  ;;  %2034 = vmatpush.bf16.msrb.mxu0 %v3226_v23  ;;  %v3186_v22 = vld [vmem:[%s3582_s5 + $0xb4] sm:$0xff]  ;;  %v3756_v23 = vld [vmem:[%s3582_s5 + $0x24] sm:$0xff] }
  0x42   : > { %1857 = vmatpush.bf16.msrb.mxu2 %v3209_v24  ;;  %v291_v24 = vrot.slane %v289_v9, 5  ;;  %v337_v9 = vshll.u32 %v3793_v3, 16 }
  0x43   : > { %1946 = vmatpush.bf16.msrb.mxu3 %v3217_v25  ;;  %v2788_v25 = vrot.slane %v3712_v52, 9 }
  0x44   : > { %1768 = vmatpush.bf16.msrb.mxu1 %v3201_v26  ;;  %2035 = vmatpush.bf16.msrb.mxu0 %v3225_v27  ;;  %v300_v26 = vor.u32 %v299_v13, %v296_v12  ;;  %v310_v27 = vor.u32 %v309_v15, %v305_v14  ;;  %v2789_v13 = vrot.slane %v3736_v62, 9  ;;  %v716_v15 = vrot.slane %v3748_v19, 5  ;;  %v3235_v62 = vld [vmem:[%s4781_s1 + $0x170] sm:$0xff] }
  0x45   : > { %1709 = vmatmul.bf16.gmra.mxu1 %v3649_v30  ;;  %1729 = vmatmul.bf16.gmra.mxu2 %v3652_v31 }
  0x46   : > { %1858 = vmatpush.bf16.msrb.mxu2 %v3208_v28  ;;  %1749 = vmatmul.bf16.gmra.mxu3 %v3184_v32  ;;  %v313_v28 = vshll.u32 %v3748_v19, 16  ;;  %v277_v32 = vrot.slane %v276_v16, 4  ;;  %v3813_v19 = vld [vmem:[%s3582_s5 + $0x28] sm:$0xf] }
  0x47   : > { %1947 = vmatpush.bf16.msrb.mxu3 %v3216_v29  ;;  %1689 = vmatmul.bf16.gmra.mxu0 %v3656_v33 }
  0x48   : > { %1769 = vmatpush.bf16.msrb.mxu1 %v3200_v34  ;;  %2036 = vmatpush.bf16.msrb.mxu0 %v3224_v35  ;;  %v287_v34 = vrot.slane %v286_v17, 4  ;;  %v708_v35 = vrot.slane %v706_v18, 4 }
  0x4a   : > { %1859 = vmatpush.bf16.msrb.mxu2 %v3207_v36  ;;  %v709_v36 = vrot.slane %v214_v0, 5 }
  0x4b   : > { %1948 = vmatpush.bf16.msrb.mxu3 %v3215_v37 }
  0x4c   : > { %1770 = vmatpush.bf16.msrb.mxu1 %v3199_v38  ;;  %2037 = vmatpush.bf16.msrb.mxu0 %v3223_v39  ;;  %v3771_v38 = vld [vmem:[%s3582_s5 + $0x18] sm:$0xf]  ;;  %v3774_v39 = vld [vmem:[%s3582_s5 + $0x1c] sm:$0xf] }
  0x4d   : > { %v331_v52 = vshrl.u32 %v3774_v39, 16 }
  0x4e   : > { %1860 = vmatpush.bf16.msrb.mxu2 %v3206_v40  ;;  %v301_v40 = vrot.slane %v300_v26, 4 }
  0x4f   : > { %1949 = vmatpush.bf16.msrb.mxu3 %v3214_v41  ;;  %v311_v41 = vrot.slane %v310_v27, 4  ;;  %v333_v0 = vrot.slane %v331_v52, 4 }
  0x50   : > { %1771 = vmatpush.bf16.msrb.mxu1 %v3198_v42  ;;  %2038 = vmatpush.bf16.msrb.mxu0 %v3222_v43  ;;  %v315_v42 = vrot.slane %v313_v28, 5  ;;  %v282_v43 = vsel %vm3760_vm4, %v277_v32, %v281_v7  ;;  %v306_v53 = vsel %vm3760_vm4, %v301_v40, %v305_v14  ;;  %v715_v14 = vrot.slane %v713_v5, 4 }
  0x51   : > { %v950_v1 = vunpack.c.l.b16 %v306_v53 }
  0x52   : > { %1861 = vmatpush.bf16.msrb.mxu2 %v3205_v44  ;;  %v292_v44 = vsel %vm3760_vm4, %v287_v34, %v291_v24  ;;  %v714_v24 = vsel %vm3765_vm5, %v2789_v13, %v713_v5  ;;  %v351_v34 = vshll.u32 %v3813_v19, 16 }
  0x53   : > { %1950 = vmatpush.bf16.msrb.mxu3 %v3213_v45  ;;  %v707_v45 = vsel %vm3765_vm5, %v2788_v25, %v706_v18  ;;  %v339_v18 = vrot.slane %v337_v9, 5  ;;  %v717_v25 = vsel %vm3765_vm5, %v715_v14, %v716_v15 }
  0x54   : > { %1772 = vmatpush.bf16.msrb.mxu1 %v3197_v46  ;;  %2039 = vmatpush.bf16.msrb.mxu0 %v3221_v47  ;;  %v710_v46 = vsel %vm3765_vm5, %v708_v35, %v709_v36  ;;  %v318_v47 = vshrl.u32 %v3771_v38, 16  ;;  %v1012_v57 = vunpack.c.l.b16 %v707_v45  ;;  %v355_v35 = vshrl.u32 %v3813_v19, 16 }
  0x55   : > { %1714 = vmatmul.bf16.gmra.mxu1 %v3704_v48  ;;  %1734 = vmatmul.bf16.gmra.mxu2 %v3181_v49  ;;  %v321_v49 = vshll.u32 %v3771_v38, 16  ;;  %v1013_v58 = vunpack.c.l.b16 %v710_v46  ;;  %v1014_v36 = vunpack.c.l.b16 %v714_v24  ;;  %v1015_v40 = vunpack.c.l.b16 %v717_v25 }
  0x56   : > { %1754 = vmatmul.bf16.gmra.mxu3 %v3185_v50  ;;  %2210 = vmatpush.bf16.msra.mxu2 %v3244_v54  ;;  %v327_v50 = vshll.u32 %v3774_v39, 16  ;;  %v316_v54 = vsel %vm3760_vm4, %v311_v41, %v315_v42  ;;  %v353_v45 = vrot.slane %v351_v34, 5  ;;  %v357_v46 = vrot.slane %v355_v35, 4 }
  0x57   : > { %1694 = vmatmul.bf16.gmra.mxu0 %v3709_v51  ;;  %2299 = vmatpush.bf16.msra.mxu3 %v3252_v55  ;;  %v948_v55 = vunpack.c.l.b16 %v282_v43  ;;  %v323_v60 = vrot.slane %v321_v49, 5  ;;  %v951_v2 = vunpack.c.l.b16 %v316_v54  ;;  %v1044_v6 = vpack.c.b16 %v1013_v58, %v1012_v57 }
  0x58   : > { %2121 = vmatpush.bf16.msra.mxu1 %v3236_v56  ;;  %2388 = vmatpush.bf16.msra.mxu0 %v3260_v59  ;;  %v949_v56 = vunpack.c.l.b16 %v292_v44  ;;  %v320_v59 = vrot.slane %v318_v47, 4  ;;  %v329_v61 = vrot.slane %v327_v50, 5  ;;  %v223_v47 = vld [vmem:[%s3582_s5 + $0x2c] sm:$0x1]  ;;  %v3831_v49 = vpack.c.b16 %v1015_v40, %v1014_v36 }
  0x59   : > { %v981_v12 = vpack.c.b16 %v951_v2, %v950_v1  ;;  %v720_v50 = vrot.slane %v3774_v39, 5  ;;  %v358_v54 = vor.u32 %v357_v46, %v353_v45  ;;  %v723_v58 = vrot.slane %v3793_v3, 5 }
  0x5a   : > { %v980_v4 = vpack.c.b16 %v949_v56, %v948_v55  ;;  %v324_v7 = vor.u32 %v323_v60, %v320_v59  ;;  %v334_v8 = vor.u32 %v333_v0, %v329_v61  ;;  %2211 = vmatpush.bf16.msra.mxu2 %v3243_v63  ;;  %v361_v55 = vshll.u32 %v223_v47, 16  ;;  %v3845_v0 = vld [vmem:[%s3582_s5 + $0x34] sm:$0xf] }
  0x5b   : > { %v2790_v56 = vrot.slane %v3771_v38, 9  ;;  %v722_v57 = vrot.slane %v720_v50, 4  ;;  %v359_v39 = vrot.slane %v358_v54, 4  ;;  %v375_v5 = vshll.u32 %v3845_v0, 16 }
  0x5c   : > { %v325_v16 = vrot.slane %v324_v7, 4  ;;  %v335_v17 = vrot.slane %v334_v8, 4  ;;  %2122 = vmatpush.bf16.msra.mxu1 %v3235_v62  ;;  %v363_v60 = vrot.slane %v361_v55, 5 }
  0x5d   : > { %v721_v1 = vsel %vm3765_vm5, %v2790_v56, %v720_v50  ;;  %v724_v38 = vsel %vm3765_vm5, %v722_v57, %v723_v58  ;;  %v377_v15 = vrot.slane %v375_v5, 5  ;;  %v3258_v50 = vld [vmem:[%s4781_s1 + $0x228] sm:$0xff] }
  0x5e   : > { %v330_v26 = vsel %vm3760_vm4, %v325_v16, %v329_v61  ;;  %v340_v27 = vsel %vm3760_vm4, %v335_v17, %v339_v18  ;;  %v3842_v61 = vld [vmem:[%s3582_s5 + $0x30] sm:$0xf]  ;;  %v364_v2 = vsel %vm3760_vm4, %v359_v39, %v363_v60  ;;  %v1016_v7 = vunpack.c.l.b16 %v721_v1  ;;  %v3861_v18 = vld [vmem:[%s3582_s5 + $0x38] sm:$0x1]  ;;  %v3904_v60 = vld [vmem:[%s3582_s5 + $0x44] sm:$0x1] }
  0x5f   : > { %v952_v41 = vunpack.c.l.b16 %v330_v26  ;;  %v953_v42 = vunpack.c.l.b16 %v340_v27  ;;  %v366_v3 = vshrl.u32 %v3842_v61, 16  ;;  %v1017_v8 = vunpack.c.l.b16 %v724_v38 }
  0x60   : > { %v727_v17 = vrot.slane %v3813_v19, 5  ;;  %v385_v24 = vshll.u32 %v3861_v18, 16  ;;  %v730_v27 = vrot.slane %v223_v47, 5  ;;  %v3872_v19 = vld [vmem:[%s3582_s5 + $0x3c] sm:$0xf]  ;;  %v734_v1 = vrot.slane %v3845_v0, 5 }
  0x61   : > { %v3834_v52 = vpack.c.b16 %v953_v42, %v952_v41  ;;  %v368_v13 = vrot.slane %v366_v3, 4  ;;  %v3863_v63 = vpack.c.b16 %v1017_v8, %v1016_v7  ;;  %v390_v41 = vshrl.u32 %v3872_v19, 16 }
  0x62   : > { %v729_v26 = vrot.slane %v727_v17, 4  ;;  %v387_v36 = vrot.slane %v385_v24, 5  ;;  %v393_v42 = vshll.u32 %v3872_v19, 16  ;;  %v409_v3 = vshll.u32 %v3904_v60, 16 }
  0x63   : > { %v392_v55 = vrot.slane %v390_v41, 4  ;;  %v2792_v5 = vrot.slane %v3842_v61, 9  ;;  %v737_v7 = vrot.slane %v3861_v18, 5 }
  0x64   : > { %v395_v56 = vrot.slane %v393_v42, 5 }
  0x65   : > { %1719 = vmatmul.bf16.gmra.mxu1 %v3751_v20  ;;  %1739 = vmatmul.bf16.gmra.mxu2 %v3182_v21  ;;  %v3251_v21 = vld [vmem:[%s4781_s1 + $0x1f0] sm:$0xff] }
  0x66   : > { %1759 = vmatmul.bf16.gmra.mxu3 %v3186_v22  ;;  %v3810_v22 = vld [vmem:[%s3582_s5 + $0x24] sm:$0xf] }
  0x67   : > { %1699 = vmatmul.bf16.gmra.mxu0 %v3756_v23  ;;  %2300 = vmatpush.bf16.msra.mxu3 %v3251_v21  ;;  %v342_v28 = vshrl.u32 %v3810_v22, 16  ;;  %v345_v32 = vshll.u32 %v3810_v22, 16  ;;  %v2791_v25 = vrot.slane %v3810_v22, 9  ;;  %v3250_v22 = vld [vmem:[%s4781_s1 + $0x1e8] sm:$0xff] }
  0x69   : > { %v344_v43 = vrot.slane %v342_v28, 4  ;;  %v347_v44 = vrot.slane %v345_v32, 5  ;;  %v3242_v28 = vld [vmem:[%s4781_s1 + $0x1a8] sm:$0xff]  ;;  %v3880_v32 = vld [vmem:[%s3582_s5 + $0x40] sm:$0xf]  ;;  %v728_v40 = vsel %vm3765_vm5, %v2791_v25, %v727_v17 }
  0x6a   : > { %2212 = vmatpush.bf16.msra.mxu2 %v3242_v28 }
  0x6b   : > { %v348_v53 = vor.u32 %v347_v44, %v344_v43  ;;  %2301 = vmatpush.bf16.msra.mxu3 %v3250_v22  ;;  %v399_v43 = vshll.u32 %v3880_v32, 16  ;;  %v403_v44 = vshrl.u32 %v3880_v32, 16 }
  0x6d   : > { %v349_v59 = vrot.slane %v348_v53, 4  ;;  %v1018_v53 = vunpack.c.l.b16 %v728_v40  ;;  %v401_v57 = vrot.slane %v399_v43, 5  ;;  %v405_v58 = vrot.slane %v403_v44, 4 }
  0x6e   : > { %v741_v40 = vrot.slane %v3880_v32, 5  ;;  %v744_v32 = vrot.slane %v3904_v60, 5 }
  0x75   : > { %1773 = vmatmul.bf16.vlgmr.msrb.gmra.mxu1 %v980_v4  ;;  %1862 = vmatmul.bf16.vlgmr.msrb.gmra.mxu2 %v1044_v6  ;;  %v369_v4 = vshll.u32 %v3842_v61, 16  ;;  %v379_v6 = vshrl.u32 %v3845_v0, 16  ;;  %v735_v61 = vsel %vm3765_vm5, %v2792_v5, %v734_v1 }
  0x76   : > { %1951 = vmatmul.bf16.vlgmr.msrb.gmra.mxu3 %v3656_v33  ;;  %v3259_v33 = vld [vmem:[%s4781_s1 + $0x230] sm:$0xff] }
  0x77   : > { %2040 = vmatmul.bf16.vlgmr.msrb.gmra.mxu0 %v981_v12  ;;  %v371_v14 = vrot.slane %v369_v4, 5  ;;  %v381_v16 = vrot.slane %v379_v6, 4  ;;  %v736_v6 = vrot.slane %v734_v1, 4 }
  0x78   : > { %2389 = vmatpush.bf16.msra.mxu0 %v3259_v33 }
  0x79   : > { %v372_v62 = vor.u32 %v371_v14, %v368_v13  ;;  %v382_v33 = vor.u32 %v381_v16, %v377_v15  ;;  %v3922_v13 = vld [vmem:[%s3582_s5 + $0x4c] sm:$0xf]  ;;  %v738_v14 = vsel %vm3765_vm5, %v736_v6, %v737_v7 }
  0x7a   : > { %v423_v18 = vshll.u32 %v3922_v13, 16  ;;  %v1021_v24 = vunpack.c.l.b16 %v738_v14 }
  0x7b   : > { %v373_v34 = vrot.slane %v372_v62, 4  ;;  %v383_v35 = vrot.slane %v382_v33, 4  ;;  %v427_v62 = vshrl.u32 %v3922_v13, 16  ;;  %v1020_v33 = vunpack.c.l.b16 %v735_v61 }
  0x7c   : > { %2390 = vmatpush.bf16.msra.mxu0 %v3258_v50  ;;  %v425_v22 = vrot.slane %v423_v18, 5 }
  0x7d   : > { %v378_v46 = vsel %vm3760_vm4, %v373_v34, %v377_v15  ;;  %v388_v47 = vsel %vm3760_vm4, %v383_v35, %v387_v36  ;;  %v429_v34 = vrot.slane %v427_v62, 4  ;;  %v3937_v35 = vld [vmem:[%s3582_s5 + $0x50] sm:$0x1]  ;;  %v3939_v36 = vpack.c.b16 %v1021_v24, %v1020_v33  ;;  %v3997_v24 = vld [vmem:[%s3582_s5 + $0x5c] sm:$0x1] }
  0x7e   : > { %v957_v39 = vunpack.c.l.b16 %v388_v47  ;;  %v433_v44 = vshll.u32 %v3937_v35, 16  ;;  %v743_v47 = vrot.slane %v741_v40, 4  ;;  %v748_v33 = vrot.slane %v3922_v13, 5 }
  0x7f   : > { %v430_v43 = vor.u32 %v429_v34, %v425_v22 }
  0x80   : > { %v745_v1 = vsel %vm3765_vm5, %v743_v47, %v744_v32  ;;  %v4020_v47 = vld [vmem:[%s3582_s5 + $0x64] sm:$0xf] }
  0x81   : > { %v1023_v61 = vunpack.c.l.b16 %v745_v1 }
  0x85   : > { %1778 = vmatmul.bf16.gmra.mxu1 %v981_v12  ;;  %1867 = vmatmul.bf16.gmra.mxu2 %v3831_v49  ;;  %v955_v12 = vunpack.c.l.b16 %v364_v2  ;;  %v406_v2 = vor.u32 %v405_v58, %v401_v57 }
  0x86   : > { %1956 = vmatmul.bf16.gmra.mxu3 %v3709_v51  ;;  %v354_v51 = vsel %vm3760_vm4, %v349_v59, %v353_v45  ;;  %v3234_v45 = vld [vmem:[%s4781_s1 + $0x168] sm:$0xff]  ;;  %v956_v59 = vunpack.c.l.b16 %v378_v46  ;;  %v2793_v46 = vrot.slane %v3872_v19, 9  ;;  %v3964_v19 = vld [vmem:[%s3582_s5 + $0x54] sm:$0xf] }
  0x87   : > { %2045 = vmatmul.bf16.gmra.mxu0 %v3834_v52  ;;  %v954_v9 = vunpack.c.l.b16 %v354_v51  ;;  %2123 = vmatpush.bf16.msra.mxu1 %v3234_v45  ;;  %v396_v51 = vor.u32 %v395_v56, %v392_v55  ;;  %v407_v8 = vrot.slane %v406_v2, 4  ;;  %v3241_v55 = vld [vmem:[%s4781_s1 + $0x1a0] sm:$0xff]  ;;  %v438_v5 = vshrl.u32 %v3964_v19, 16 }
  0x88   : > { %v3910_v4 = vpack.c.b16 %v957_v39, %v956_v59  ;;  %v3249_v56 = vld [vmem:[%s4781_s1 + $0x1e0] sm:$0xff]  ;;  %2213 = vmatpush.bf16.msra.mxu2 %v3241_v55  ;;  %v742_v60 = vsel %vm3765_vm5, %v2793_v46, %v741_v40  ;;  %v441_v6 = vshll.u32 %v3964_v19, 16 }
  0x89   : > { %v3865_v21 = vpack.c.b16 %v955_v12, %v954_v9  ;;  %v397_v0 = vrot.slane %v396_v51, 4  ;;  %v411_v9 = vrot.slane %v409_v3, 5  ;;  %v3919_v12 = vld [vmem:[%s3582_s5 + $0x48] sm:$0xf]  ;;  %2302 = vmatpush.bf16.msra.mxu3 %v3249_v56  ;;  %v3233_v59 = vld [vmem:[%s4781_s1 + $0x160] sm:$0xff] }
  0x8a   : > { %v417_v17 = vshll.u32 %v3919_v12, 16  ;;  %v2794_v13 = vrot.slane %v3919_v12, 9  ;;  %v4017_v46 = vld [vmem:[%s3582_s5 + $0x60] sm:$0xf] }
  0x8b   : > { %v402_v15 = vsel %vm3760_vm4, %v397_v0, %v401_v57  ;;  %v412_v16 = vsel %vm3760_vm4, %v407_v8, %v411_v9  ;;  %2124 = vmatpush.bf16.msra.mxu1 %v3233_v59  ;;  %v3257_v8 = vld [vmem:[%s4781_s1 + $0x220] sm:$0xff]  ;;  %v1022_v9 = vunpack.c.l.b16 %v742_v60  ;;  %v465_v56 = vshll.u32 %v4017_v46, 16 }
  0x8c   : > { %v958_v25 = vunpack.c.l.b16 %v402_v15  ;;  %v419_v28 = vrot.slane %v417_v17, 5  ;;  %2391 = vmatpush.bf16.msra.mxu0 %v3257_v8  ;;  %v471_v59 = vshll.u32 %v4020_v47, 16  ;;  %v475_v60 = vshrl.u32 %v4020_v47, 16 }
  0x8d   : > { %v467_v8 = vrot.slane %v465_v56, 5  ;;  %v4072_v56 = vld [vmem:[%s3582_s5 + $0x6c] sm:$0xf] }
  0x95   : > { %1783 = vmatmul.bf16.gmra.mxu1 %v3834_v52  ;;  %1872 = vmatmul.bf16.gmra.mxu2 %v3863_v63 }
  0x96   : > { %1961 = vmatmul.bf16.gmra.mxu3 %v3756_v23  ;;  %v731_v23 = vsel %vm3765_vm5, %v729_v26, %v730_v27  ;;  %v959_v26 = vunpack.c.l.b16 %v412_v16  ;;  %v440_v16 = vrot.slane %v438_v5, 4 }
  0x97   : > { %2050 = vmatmul.bf16.gmra.mxu0 %v3865_v21  ;;  %v1019_v54 = vunpack.c.l.b16 %v731_v23 }
  0x98   : > { %v3944_v41 = vpack.c.b16 %v959_v26, %v958_v25  ;;  %v4001_v26 = vpack.c.b16 %v1023_v61, %v1022_v9  ;;  %v473_v9 = vrot.slane %v471_v59, 5  ;;  %v477_v61 = vrot.slane %v475_v60, 4  ;;  %v4075_v59 = vld [vmem:[%s3582_s5 + $0x70] sm:$0xf] }
  0x99   : > { %v3907_v38 = vpack.c.b16 %v1019_v54, %v1018_v53  ;;  %v431_v53 = vrot.slane %v430_v43, 4  ;;  %v435_v54 = vrot.slane %v433_v44, 5  ;;  %v750_v43 = vrot.slane %v748_v33, 4 }
  0x9a   : > { %4811 = vst [vmem:[#allocation11_spill] sm:$0xff] %v4001_v26  ;;  %v751_v44 = vrot.slane %v3937_v35, 5 }
  0x9b   : > { %v436_v2 = vsel %vm3760_vm4, %v431_v53, %v435_v54 }
  0x9c   : > { %v961_v15 = vunpack.c.l.b16 %v436_v2  ;;  %v752_v35 = vsel %vm3765_vm5, %v750_v43, %v751_v44 }
  0xa5   : > { %1788 = vmatmul.bf16.gmra.mxu1 %v3865_v21  ;;  %1877 = vmatmul.bf16.gmra.mxu2 %v3907_v38 }
  0xa6   : > { %1966 = vmatmul.bf16.gmra.mxu3 %v3591_v10  ;;  %v414_v10 = vshrl.u32 %v3919_v12, 16  ;;  %v749_v12 = vsel %vm3765_vm5, %v2794_v13, %v748_v33 }
  0xa7   : > { %2055 = vmatmul.bf16.gmra.mxu0 %v3910_v4 }
  0xa8   : > { %v416_v27 = vrot.slane %v414_v10, 4  ;;  %v443_v10 = vrot.slane %v441_v6, 5  ;;  %v1024_v6 = vunpack.c.l.b16 %v749_v12 }
  0xaa   : > { %v420_v42 = vor.u32 %v419_v28, %v416_v27  ;;  %v444_v34 = vor.u32 %v443_v10, %v440_v16  ;;  %v4043_v16 = vld [vmem:[%s3582_s5 + $0x68] sm:$0x1] }
  0xac   : > { %v421_v50 = vrot.slane %v420_v42, 4  ;;  %v457_v42 = vshll.u32 %v3997_v24, 16  ;;  %v445_v32 = vrot.slane %v444_v34, 4 }
  0xae   : > { %v426_v51 = vsel %vm3760_vm4, %v421_v50, %v425_v22  ;;  %v459_v53 = vrot.slane %v457_v42, 5  ;;  %v481_v42 = vshll.u32 %v4043_v16, 16 }
  0xaf   : > { %v960_v14 = vunpack.c.l.b16 %v426_v51 }
  0xb1   : > { %v4005_v28 = vpack.c.b16 %v961_v15, %v960_v14 }
  0xb2   : > { %v3942_v23 = vpop.f32.mrf.mxu1 }
  0xb3   : > { %4812 = vst [vmem:[#allocation12_spill] sm:$0xff] %v4005_v28 }
  0xb4   : > { %v3947_v45 = vpop.f32.mrf.mxu0 }
  0xb5   : > { %1793 = vmatmul.bf16.gmra.mxu1 %v3910_v4  ;;  %1882 = vmatmul.bf16.gmra.mxu2 %v3939_v36 }
  0xb6   : > { %1971 = vmatmul.bf16.gmra.mxu3 %v3649_v30  ;;  %v3967_v30 = vld [vmem:[%s3582_s5 + $0x58] sm:$0xf] }
  0xb7   : > { %2060 = vmatmul.bf16.gmra.mxu0 %v3944_v41  ;;  %v447_v7 = vshll.u32 %v3967_v30, 16  ;;  %v451_v0 = vshrl.u32 %v3967_v30, 16 }
  0xb8   : > { %v3961_v57 = vpop.f32.mrf.mxu2 }
  0xb9   : > { %v3969_v58 = vpop.f32.mrf.mxu3  ;;  %v449_v17 = vrot.slane %v447_v7, 5  ;;  %v453_v18 = vrot.slane %v451_v0, 4  ;;  %v1025_v7 = vunpack.c.l.b16 %v752_v35  ;;  %v483_v35 = vrot.slane %v481_v42, 5 }
  0xba   : > { %4809 = vst [vmem:[#allocation9_spill] sm:$0xff] %v3969_v58  ;;  %v3974_v39 = vpop.f32.mrf.mxu1 }
  0xbb   : > { %v454_v40 = vor.u32 %v453_v18, %v449_v17  ;;  %v450_v2 = vsel %vm3760_vm4, %v445_v32, %v449_v17  ;;  %v755_v18 = vrot.slane %v3967_v30, 5  ;;  %v4050_v17 = vpack.c.b16 %v1025_v7, %v1024_v6 }
  0xbc   : > { %v3984_v3 = vpop.f32.mrf.mxu0  ;;  %v962_v14 = vunpack.c.l.b16 %v450_v2  ;;  %v2795_v32 = vrot.slane %v3964_v19, 9  ;;  %v758_v30 = vrot.slane %v3997_v24, 5  ;;  %v3248_v19 = vld [vmem:[%s4781_s1 + $0x1d8] sm:$0xff] }
  0xbd   : > { %v455_v50 = vrot.slane %v454_v40, 4  ;;  %4815 = vst [vmem:[#allocation15_spill] sm:$0xff] %v4050_v17  ;;  %v478_v40 = vor.u32 %v477_v61, %v473_v9  ;;  %2303 = vmatpush.bf16.msra.mxu3 %v3248_v19  ;;  %v495_v61 = vshll.u32 %v4075_v59, 16 }
  0xbf   : > { %v460_v5 = vsel %vm3760_vm4, %v455_v50, %v459_v53  ;;  %v757_v50 = vrot.slane %v755_v18, 4  ;;  %v479_v12 = vrot.slane %v478_v40, 4 }
  0xc0   : > { %v3993_v62 = vpop.f32.mrf.mxu2  ;;  %v963_v15 = vunpack.c.l.b16 %v460_v5 }
  0xc1   : > { %v3999_v25 = vpop.f32.mrf.mxu3  ;;  %v759_v2 = vsel %vm3765_vm5, %v757_v50, %v758_v30  ;;  %v484_v6 = vsel %vm3760_vm4, %v479_v12, %v483_v35  ;;  %v4104_v35 = vld [vmem:[%s3582_s5 + $0x74] sm:$0x1] }
  0xc2   : > { %4810 = vst [vmem:[#allocation10_spill] sm:$0xff] %v3999_v25  ;;  %v4003_v27 = vpop.f32.mrf.mxu1  ;;  %v4055_v43 = vpack.c.b16 %v963_v15, %v962_v14  ;;  %v499_v14 = vshrl.u32 %v4075_v59, 16  ;;  %v1027_v40 = vunpack.c.l.b16 %v759_v2 }
  0xc4   : > { %v4007_v22 = vpop.f32.mrf.mxu0  ;;  %4816 = vst [vmem:[#allocation16_spill] sm:$0xff] %v4055_v43  ;;  %v501_v12 = vrot.slane %v499_v14, 4 }
  0xc5   : > { %1798 = vmatmul.bf16.gmra.mxu1 %v3944_v41  ;;  %1887 = vmatmul.bf16.gmra.mxu2 %v4001_v26 }
  0xc6   : > { %1976 = vmatmul.bf16.gmra.mxu3 %v3704_v48  ;;  %v462_v48 = vshrl.u32 %v4017_v46, 16 }
  0xc7   : > { %2065 = vmatmul.bf16.gmra.mxu0 %v4005_v28 }
  0xc8   : > { %v4022_v54 = vpop.f32.mrf.mxu2  ;;  %v464_v0 = vrot.slane %v462_v48, 4  ;;  %v3240_v48 = vld [vmem:[%s4781_s1 + $0x198] sm:$0xff] }
  0xc9   : > { %v4028_v55 = vpop.f32.mrf.mxu3  ;;  %2214 = vmatpush.bf16.msra.mxu2 %v3240_v48 }
  0xca   : > { %4813 = vst [vmem:[#allocation13_spill] sm:$0xff] %v4028_v55  ;;  %v4034_v1 = vpop.f32.mrf.mxu1  ;;  %v468_v34 = vor.u32 %v467_v8, %v464_v0  ;;  %v486_v0 = vshrl.u32 %v4072_v56, 16  ;;  %v489_v8 = vshll.u32 %v4072_v56, 16 }
  0xcc   : > { %v4036_v51 = vpop.f32.mrf.mxu0  ;;  %v469_v53 = vrot.slane %v468_v34, 4  ;;  %v488_v50 = vrot.slane %v486_v0, 4  ;;  %v491_v30 = vrot.slane %v489_v8, 5  ;;  %v505_v0 = vshll.u32 %v4104_v35, 16 }
  0xce   : > { %v474_v5 = vsel %vm3760_vm4, %v469_v53, %v473_v9  ;;  %v3232_v9 = vld [vmem:[%s4781_s1 + $0x158] sm:$0xff]  ;;  %v497_v53 = vrot.slane %v495_v61, 5  ;;  %v2796_v61 = vrot.slane %v4017_v46, 9 }
  0xcf   : > { %v964_v42 = vunpack.c.l.b16 %v474_v5  ;;  %2125 = vmatpush.bf16.msra.mxu1 %v3232_v9  ;;  %v492_v5 = vor.u32 %v491_v30, %v488_v50 }
  0xd0   : > { %v4045_v10 = vpop.f32.mrf.mxu2 }
  0xd1   : > { %v4048_v33 = vpop.f32.mrf.mxu3  ;;  %v493_v9 = vrot.slane %v492_v5, 4 }
  0xd2   : > { %4814 = vst [vmem:[#allocation14_spill] sm:$0xff] %v4048_v33  ;;  %v4053_v13 = vpop.f32.mrf.mxu1  ;;  %v762_v33 = vrot.slane %v4020_v47, 5  ;;  %v765_v47 = vrot.slane %v4043_v16, 5 }
  0xd3   : > { %v498_v16 = vsel %vm3760_vm4, %v493_v9, %v497_v53 }
  0xd4   : > { %v4057_v44 = vpop.f32.mrf.mxu0  ;;  %v764_v14 = vrot.slane %v762_v33, 4 }
  0xd5   : > { %1803 = vmatmul.bf16.gmra.mxu1 %v4005_v28  ;;  %1892 = vmatmul.bf16.gmra.mxu2 %v4050_v17 }
  0xd6   : > { %1981 = vmatmul.bf16.gmra.mxu3 %v3751_v20  ;;  %v756_v20 = vsel %vm3765_vm5, %v2795_v32, %v755_v18  ;;  %v3256_v18 = vld [vmem:[%s4781_s1 + $0x218] sm:$0xff]  ;;  %v965_v32 = vunpack.c.l.b16 %v484_v6  ;;  %v502_v6 = vor.u32 %v501_v12, %v497_v53  ;;  %v766_v46 = vsel %vm3765_vm5, %v764_v14, %v765_v47 }
  0xd7   : > { %2070 = vmatmul.bf16.gmra.mxu0 %v4055_v43  ;;  %v1026_v34 = vunpack.c.l.b16 %v756_v20  ;;  %v966_v14 = vunpack.c.l.b16 %v498_v16 }
  0xd8   : > { %v4077_v24 = vpop.f32.mrf.mxu2  ;;  %2392 = vmatpush.bf16.msra.mxu0 %v3256_v18  ;;  %v4115_v2 = vpack.c.b16 %v965_v32, %v964_v42  ;;  %v503_v18 = vrot.slane %v502_v6, 4  ;;  %v4129_v42 = vld [vmem:[%s3582_s5 + $0x78] sm:$0xf]  ;;  %v4132_v32 = vld [vmem:[%s3582_s5 + $0x7c] sm:$0xf] }
  0xd9   : > { %v4079_v60 = vpop.f32.mrf.mxu3  ;;  %v510_v6 = vshrl.u32 %v4129_v42, 16 }
  0xda   : > { %4817 = vst [vmem:[#allocation17_spill] sm:$0xff] %v4079_v60  ;;  %v4089_v7 = vpop.f32.mrf.mxu1  ;;  %v4110_v60 = vpack.c.b16 %v1027_v40, %v1026_v34  ;;  %v507_v34 = vrot.slane %v505_v0, 5  ;;  %v513_v0 = vshll.u32 %v4129_v42, 16 }
  0xdb   : > { %4820 = vst [vmem:[#allocation20_spill] sm:$0xff] %v4115_v2  ;;  %v512_v55 = vrot.slane %v510_v6, 4 }
  0xdc   : > { %v4095_v15 = vpop.f32.mrf.mxu0  ;;  %4819 = vst [vmem:[#allocation19_spill] sm:$0xff] %v4110_v60  ;;  %v508_v12 = vsel %vm3760_vm4, %v503_v18, %v507_v34  ;;  %v515_v53 = vrot.slane %v513_v0, 5  ;;  %v769_v34 = vrot.slane %v4075_v59, 5  ;;  %v2797_v59 = vrot.slane %v4072_v56, 9 }
  0xdd   : > { %v967_v47 = vunpack.c.l.b16 %v508_v12 }
  0xde   : > { %v771_v0 = vrot.slane %v769_v34, 4 }
  0xe0   : > { %v4106_v48 = vpop.f32.mrf.mxu2 }
  0xe1   : > { %v4108_v19 = vpop.f32.mrf.mxu3 }
  0xe2   : > { %4818 = vst [vmem:[#allocation18_spill] sm:$0xff] %v4108_v19  ;;  %v4113_v20 = vpop.f32.mrf.mxu1  ;;  %v1029_v19 = vunpack.c.l.b16 %v766_v46 }
  0xe4   : > { %v4118_v8 = vpop.f32.mrf.mxu0 }
  0xe5   : > { %1808 = vmatmul.bf16.gmra.mxu1 %v4055_v43  ;;  %1897 = vmatmul.bf16.gmra.mxu2 %v4110_v60  ;;  %v4156_v43 = vld [vmem:[%s3582_s5 + $0x80] sm:$0x1] }
  0xe6   : > { %1986 = vmatmul.bf16.gmra.mxu3 %v3594_v11  ;;  %v763_v11 = vsel %vm3765_vm5, %v2796_v61, %v762_v33  ;;  %v523_v33 = vshrl.u32 %v4132_v32, 16  ;;  %v529_v6 = vshll.u32 %v4156_v43, 16 }
  0xe7   : > { %2075 = vmatmul.bf16.gmra.mxu0 %v4115_v2  ;;  %v1028_v61 = vunpack.c.l.b16 %v763_v11  ;;  %v4162_v11 = vpack.c.b16 %v967_v47, %v966_v14  ;;  %v770_v14 = vsel %vm3765_vm5, %v2797_v59, %v769_v34 }
  0xe8   : > { %v4126_v40 = vpop.f32.mrf.mxu2  ;;  %v525_v60 = vrot.slane %v523_v33, 4  ;;  %v772_v33 = vrot.slane %v4104_v35, 5  ;;  %v531_v35 = vrot.slane %v529_v6, 5 }
  0xe9   : > { %4821 = vst [vmem:[#allocation21_spill] sm:$0xff] %v4126_v40  ;;  %v4134_v50 = vpop.f32.mrf.mxu3  ;;  %v4160_v58 = vpack.c.b16 %v1029_v19, %v1028_v61  ;;  %v4171_v19 = vld [vmem:[%s3582_s5 + $0x84] sm:$0xf]  ;;  %v776_v40 = vrot.slane %v4132_v32, 5 }
  0xea   : > { %4822 = vst [vmem:[#allocation22_spill] sm:$0xff] %v4134_v50  ;;  %v4136_v30 = vpop.f32.mrf.mxu1  ;;  %v519_v50 = vshll.u32 %v4132_v32, 16  ;;  %v534_v47 = vshrl.u32 %v4171_v19, 16 }
  0xeb   : > { %4825 = vst [vmem:[#allocation25_spill] sm:$0xff] %v4160_v58 }
  0xec   : > { %v4146_v5 = vpop.f32.mrf.mxu0  ;;  %v521_v9 = vrot.slane %v519_v50, 5  ;;  %4826 = vst [vmem:[#allocation26_spill] sm:$0xff] %v4162_v11  ;;  %v516_v50 = vor.u32 %v515_v53, %v512_v55  ;;  %v4179_v55 = vld [vmem:[%s3582_s5 + $0x88] sm:$0xf] }
  0xee   : > { %v526_v12 = vor.u32 %v525_v60, %v521_v9  ;;  %v517_v56 = vrot.slane %v516_v50, 4  ;;  %v547_v50 = vshrl.u32 %v4179_v55, 16 }
  0xf0   : > { %v4152_v18 = vpop.f32.mrf.mxu2  ;;  %v527_v60 = vrot.slane %v526_v12, 4  ;;  %v522_v59 = vsel %vm3760_vm4, %v517_v56, %v521_v9 }
  0xf1   : > { %4823 = vst [vmem:[#allocation23_spill] sm:$0xff] %v4152_v18  ;;  %v4158_v25 = vpop.f32.mrf.mxu3  ;;  %v968_v56 = vunpack.c.l.b16 %v522_v59 }
  0xf2   : > { %4824 = vst [vmem:[#allocation24_spill] sm:$0xff] %v4158_v25  ;;  %v1774_v17 = vpop.f32.mrf.mxu1 }
  0xf3   : > { %v1775_v46 = vadd.f32 %v1774_v17, %v3947_v45  ;;  %v3239_v45 = vld [vmem:[%s4781_s1 + $0x190] sm:$0xff] }
  0xf4   : > { %v2041_v16 = vpop.f32.mrf.mxu0  ;;  %v3247_v17 = vld [vmem:[%s4781_s1 + $0x1d0] sm:$0xff]  ;;  %2215 = vmatpush.bf16.msra.mxu2 %v3239_v45  ;;  %v1030_v45 = vunpack.c.l.b16 %v770_v14 }
  0xf5   : > { %1813 = vmatmul.bf16.gmra.mxu1 %v4115_v2  ;;  %1902 = vmatmul.bf16.gmra.mxu2 %v4160_v58  ;;  %v537_v58 = vshll.u32 %v4171_v19, 16  ;;  %v543_v2 = vshll.u32 %v4179_v55, 16 }
  0xf6   : > { %1991 = vmatmul.bf16.gmra.mxu3 %v3652_v31  ;;  %v773_v31 = vsel %vm3765_vm5, %v771_v0, %v772_v33  ;;  %v532_v0 = vsel %vm3760_vm4, %v527_v60, %v531_v35  ;;  %v3255_v33 = vld [vmem:[%s4781_s1 + $0x210] sm:$0xff]  ;;  %v4206_v35 = vld [vmem:[%s3582_s5 + $0x8c] sm:$0x1] }
  0xf7   : > { %2080 = vmatmul.bf16.gmra.mxu0 %v4162_v11  ;;  %2304 = vmatpush.bf16.msra.mxu3 %v3247_v17  ;;  %v536_v17 = vrot.slane %v534_v47, 4  ;;  %v969_v60 = vunpack.c.l.b16 %v532_v0  ;;  %v2798_v0 = vrot.slane %v4129_v42, 9 }
  0xf8   : > { %v1863_v61 = vpop.f32.mrf.mxu2  ;;  %2393 = vmatpush.bf16.msra.mxu0 %v3255_v33 }
  0xf9   : > { %v1864_v53 = vadd.f32 %v1863_v61, %v1775_v46  ;;  %v1952_v25 = vpop.f32.mrf.mxu3  ;;  %v3231_v46 = vld [vmem:[%s4781_s1 + $0x150] sm:$0xff]  ;;  %v545_v61 = vrot.slane %v543_v2, 5  ;;  %v777_v42 = vsel %vm3765_vm5, %v2798_v0, %v776_v40 }
  0xfa   : > { %v1776_v12 = vpop.f32.mrf.mxu1  ;;  %2126 = vmatpush.bf16.msra.mxu1 %v3231_v46  ;;  %v778_v46 = vrot.slane %v776_v40, 4 }
  0xfb   : > { %v1953_v6 = vadd.f32 %v1952_v25, %v1864_v53  ;;  %v1777_v28 = vadd.f32 %v1776_v12, %v3984_v3  ;;  %v1031_v25 = vunpack.c.l.b16 %v773_v31  ;;  %v539_v3 = vrot.slane %v537_v58, 5 }
  0xfc   : > { %v2043_v34 = vpop.f32.mrf.mxu0  ;;  %v549_v53 = vrot.slane %v547_v50, 4  ;;  %v553_v58 = vshll.u32 %v4206_v35, 16  ;;  %v4212_v50 = vpack.c.b16 %v969_v60, %v968_v56 }
  0xfd   : > { %v4203_v9 = vadd.f32 %v2041_v16, %v1953_v6  ;;  %v4208_v18 = vpack.c.b16 %v1031_v25, %v1030_v45  ;;  %v540_v31 = vor.u32 %v539_v3, %v536_v17  ;;  %v4222_v17 = vld [vmem:[%s3582_s5 + $0x78] sm:$0xff] }
  0xfe   : > { %v550_v47 = vor.u32 %v549_v53, %v545_v61  ;;  %v555_v45 = vrot.slane %v553_v58, 5  ;;  %4830 = vst [vmem:[#allocation30_spill] sm:$0xff] %v4222_v17 }
  0xff   : > { %4827 = vst [vmem:[#allocation27_spill] sm:$0xff] %v4203_v9  ;;  %v541_v32 = vrot.slane %v540_v31, 4 }
 0x100   : > { %v1865_v12 = vpop.f32.mrf.mxu2  ;;  %4828 = vst [vmem:[#allocation28_spill] sm:$0xff] %v4208_v18  ;;  %v551_v33 = vrot.slane %v550_v47, 4 }
 0x101   : > { %v1866_v26 = vadd.f32 %v1865_v12, %v1777_v28  ;;  %v1954_v14 = vpop.f32.mrf.mxu3  ;;  %v779_v28 = vrot.slane %v4156_v43, 5  ;;  %v546_v56 = vsel %vm3760_vm4, %v541_v32, %v545_v61 }
 0x102   : > { %v1779_v2 = vpop.f32.mrf.mxu1  ;;  %v556_v60 = vsel %vm3760_vm4, %v551_v33, %v555_v45  ;;  %v970_v61 = vunpack.c.l.b16 %v546_v56 }
 0x103   : > { %v1955_v16 = vadd.f32 %v1954_v14, %v1866_v26  ;;  %v1780_v6 = vadd.f32 %v1779_v2, %v4007_v22  ;;  %v4227_v26 = vld [vmem:[%s3582_s5 + $0x90] sm:$0xf]  ;;  %v4230_v22 = vld [vmem:[%s3582_s5 + $0x94] sm:$0xf] }
 0x104   : > { %v2046_v59 = vpop.f32.mrf.mxu0  ;;  %v558_v14 = vshrl.u32 %v4227_v26, 16  ;;  %v561_v31 = vshll.u32 %v4227_v26, 16  ;;  %v567_v47 = vshll.u32 %v4230_v22, 16  ;;  %v571_v40 = vshrl.u32 %v4230_v22, 16 }
 0x105   : > { %1818 = vmatmul.bf16.gmra.mxu1 %v4162_v11  ;;  %1907 = vmatmul.bf16.gmra.mxu2 %v4208_v18  ;;  %v4219_v25 = vadd.f32 %v2043_v34, %v1955_v16  ;;  %v780_v34 = vsel %vm3765_vm5, %v778_v46, %v779_v28  ;;  %v971_v46 = vunpack.c.l.b16 %v556_v60 }
 0x106   : > { %1996 = vmatmul.bf16.gmra.mxu3 %v4222_v17  ;;  %v1033_v0 = vunpack.c.l.b16 %v780_v34  ;;  %v560_v32 = vrot.slane %v558_v14, 4  ;;  %v563_v33 = vrot.slane %v561_v31, 5  ;;  %v569_v45 = vrot.slane %v567_v47, 5  ;;  %v4264_v47 = vld [vmem:[%s3582_s5 + $0x84] sm:$0xff] }
 0x107   : > { %4829 = vst [vmem:[#allocation29_spill] sm:$0xff] %v4219_v25  ;;  %2085 = vmatmul.bf16.gmra.mxu0 %v4212_v50  ;;  %v4248_v25 = vld [vmem:[%s3582_s5 + $0x98] sm:$0x1]  ;;  %v786_v14 = vrot.slane %v4206_v35, 5  ;;  %v4275_v35 = vld [vmem:[%s3582_s5 + $0x9c] sm:$0xf] }
 0x108   : > { %v1868_v43 = vpop.f32.mrf.mxu2  ;;  %v577_v34 = vshll.u32 %v4248_v25, 16 }
 0x109   : > { %v1869_v3 = vadd.f32 %v1868_v43, %v1780_v6  ;;  %v1957_v53 = vpop.f32.mrf.mxu3  ;;  %v1032_v6 = vunpack.c.l.b16 %v777_v42  ;;  %v573_v43 = vrot.slane %v571_v40, 4  ;;  %v3238_v40 = vld [vmem:[%s4781_s1 + $0x188] sm:$0xff] }
 0x10a   : > { %v1781_v12 = vpop.f32.mrf.mxu1  ;;  %2216 = vmatpush.bf16.msra.mxu2 %v3238_v40 }
 0x10b   : > { %v1958_v58 = vadd.f32 %v1957_v53, %v1869_v3  ;;  %v1782_v2 = vadd.f32 %v1781_v12, %v4036_v51  ;;  %v4250_v11 = vpack.c.b16 %v1033_v0, %v1032_v6  ;;  %v783_v51 = vrot.slane %v4179_v55, 5 }
 0x10c   : > { %v2048_v16 = vpop.f32.mrf.mxu0  ;;  %v4253_v3 = vpack.c.b16 %v971_v46, %v970_v61  ;;  %v564_v53 = vor.u32 %v563_v33, %v560_v32 }
 0x10d   : > { %v4245_v28 = vadd.f32 %v2046_v59, %v1958_v58  ;;  %v574_v59 = vor.u32 %v573_v43, %v569_v45  ;;  %v785_v55 = vrot.slane %v783_v51, 4  ;;  %v582_v43 = vshrl.u32 %v4275_v35, 16 }
 0x10f   : > { %4831 = vst [vmem:[#allocation31_spill] sm:$0xff] %v4245_v28  ;;  %v787_v61 = vsel %vm3765_vm5, %v785_v55, %v786_v14 }
 0x110   : > { %v1870_v9 = vpop.f32.mrf.mxu2  ;;  %v1035_v55 = vunpack.c.l.b16 %v787_v61 }
 0x111   : > { %v1871_v17 = vadd.f32 %v1870_v9, %v1782_v2  ;;  %v1959_v18 = vpop.f32.mrf.mxu3  ;;  %v2799_v9 = vrot.slane %v4171_v19, 9  ;;  %v3246_v19 = vld [vmem:[%s4781_s1 + $0x1c8] sm:$0xff]  ;;  %v4278_v2 = vld [vmem:[%s3582_s5 + $0xa0] sm:$0xf] }
 0x112   : > { %v1784_v42 = vpop.f32.mrf.mxu1  ;;  %2305 = vmatpush.bf16.msra.mxu3 %v3246_v19 }
 0x113   : > { %v1960_v56 = vadd.f32 %v1959_v18, %v1871_v17  ;;  %v1785_v60 = vadd.f32 %v1784_v42, %v4057_v44  ;;  %v565_v44 = vrot.slane %v564_v53, 4  ;;  %v575_v18 = vrot.slane %v574_v59, 4 }
 0x114   : > { %v2051_v12 = vpop.f32.mrf.mxu0  ;;  %v579_v17 = vrot.slane %v577_v34, 5  ;;  %v784_v0 = vsel %vm3765_vm5, %v2799_v9, %v783_v51  ;;  %v585_v42 = vshll.u32 %v4275_v35, 16  ;;  %v591_v51 = vshll.u32 %v4278_v2, 16 }
 0x115   : > { %1823 = vmatmul.bf16.gmra.mxu1 %v4212_v50  ;;  %1912 = vmatmul.bf16.gmra.mxu2 %v4250_v11  ;;  %v4261_v31 = vadd.f32 %v2048_v16, %v1960_v56  ;;  %v570_v32 = vsel %vm3760_vm4, %v565_v44, %v569_v45  ;;  %v595_v56 = vshrl.u32 %v4278_v2, 16  ;;  %v3230_v45 = vld [vmem:[%s4781_s1 + $0x148] sm:$0xff]  ;;  %v1034_v9 = vunpack.c.l.b16 %v784_v0 }
 0x116   : > { %2001 = vmatmul.bf16.gmra.mxu3 %v4264_v47  ;;  %v580_v33 = vsel %vm3760_vm4, %v575_v18, %v579_v17  ;;  %2127 = vmatpush.bf16.msra.mxu1 %v3230_v45  ;;  %v584_v18 = vrot.slane %v582_v43, 4  ;;  %v587_v17 = vrot.slane %v585_v42, 5  ;;  %v593_v40 = vrot.slane %v591_v51, 5  ;;  %v4316_v45 = vld [vmem:[%s3582_s5 + $0xa8] sm:$0xf] }
 0x117   : > { %4832 = vst [vmem:[#allocation32_spill] sm:$0xff] %v4261_v31  ;;  %2090 = vmatmul.bf16.gmra.mxu0 %v4253_v3  ;;  %v973_v44 = vunpack.c.l.b16 %v580_v33  ;;  %v597_v19 = vrot.slane %v595_v56, 4  ;;  %v4305_v0 = vpack.c.b16 %v1035_v55, %v1034_v9  ;;  %v2800_v51 = vrot.slane %v4227_v26, 9 }
 0x118   : > { %v1873_v58 = vpop.f32.mrf.mxu2  ;;  %v793_v56 = vrot.slane %v4248_v25, 5 }
 0x119   : > { %v1874_v16 = vadd.f32 %v1873_v58, %v1785_v60  ;;  %v1962_v6 = vpop.f32.mrf.mxu3  ;;  %v3254_v60 = vld [vmem:[%s4781_s1 + $0x208] sm:$0xff] }
 0x11a   : > { %v1786_v46 = vpop.f32.mrf.mxu1  ;;  %2394 = vmatpush.bf16.msra.mxu0 %v3254_v60 }
 0x11b   : > { %v1963_v53 = vadd.f32 %v1962_v6, %v1874_v16  ;;  %v1787_v59 = vadd.f32 %v1786_v46, %v4095_v15  ;;  %v972_v15 = vunpack.c.l.b16 %v570_v32  ;;  %v790_v16 = vrot.slane %v4230_v22, 5  ;;  %v4303_v6 = vld [vmem:[%s3582_s5 + $0xa4] sm:$0x1] }
 0x11c   : > { %v2053_v34 = vpop.f32.mrf.mxu0  ;;  %v588_v32 = vor.u32 %v587_v17, %v584_v18  ;;  %v601_v22 = vshll.u32 %v4303_v6, 16 }
 0x11d   : > { %v4299_v14 = vadd.f32 %v2051_v12, %v1963_v53  ;;  %v4307_v12 = vpack.c.b16 %v973_v44, %v972_v15  ;;  %v598_v53 = vor.u32 %v597_v19, %v593_v40  ;;  %v791_v15 = vsel %vm3765_vm5, %v2800_v51, %v790_v16 }
 0x11e   : > { %v589_v26 = vrot.slane %v588_v32, 4  ;;  %v603_v55 = vrot.slane %v601_v22, 5  ;;  %v609_v19 = vshll.u32 %v4316_v45, 16 }
 0x11f   : > { %4833 = vst [vmem:[#allocation33_spill] sm:$0xff] %v4299_v14  ;;  %v599_v9 = vrot.slane %v598_v53, 4 }
 0x120   : > { %v1875_v58 = vpop.f32.mrf.mxu2 }
 0x121   : > { %v1876_v46 = vadd.f32 %v1875_v58, %v1787_v59  ;;  %v1964_v31 = vpop.f32.mrf.mxu3  ;;  %v792_v59 = vrot.slane %v790_v16, 4  ;;  %v594_v16 = vsel %vm3760_vm4, %v589_v26, %v593_v40  ;;  %v604_v22 = vsel %vm3760_vm4, %v599_v9, %v603_v55 }
 0x122   : > { %v1789_v61 = vpop.f32.mrf.mxu1  ;;  %v975_v28 = vunpack.c.l.b16 %v604_v22  ;;  %v797_v40 = vrot.slane %v4278_v2, 5  ;;  %v4371_v22 = vld [vmem:[%s3582_s5 + $0xb4] sm:$0xf] }
 0x123   : > { %v1965_v33 = vadd.f32 %v1964_v31, %v1876_v46  ;;  %v1790_v43 = vadd.f32 %v1789_v61, %v4118_v8  ;;  %v4321_v31 = vld [vmem:[%s3582_s5 + $0x90] sm:$0xff]  ;;  %v4326_v8 = vld [vmem:[%s3582_s5 + $0xac] sm:$0xf]  ;;  %v794_v44 = vsel %vm3765_vm5, %v792_v59, %v793_v56  ;;  %v611_v56 = vrot.slane %v609_v19, 5 }
 0x124   : > { %v2056_v42 = vpop.f32.mrf.mxu0  ;;  %4835 = vst [vmem:[#allocation35_spill] sm:$0xff] %v4321_v31  ;;  %v615_v58 = vshll.u32 %v4326_v8, 16  ;;  %v619_v46 = vshrl.u32 %v4326_v8, 16  ;;  %v1037_v51 = vunpack.c.l.b16 %v794_v44 }
 0x125   : > { %1828 = vmatmul.bf16.gmra.mxu1 %v4253_v3  ;;  %1917 = vmatmul.bf16.gmra.mxu2 %v4305_v0  ;;  %v4318_v60 = vadd.f32 %v2053_v34, %v1965_v33  ;;  %v606_v34 = vshrl.u32 %v4316_v45, 16 }
 0x126   : > { %2006 = vmatmul.bf16.gmra.mxu3 %v4321_v31  ;;  %v974_v31 = vunpack.c.l.b16 %v594_v16 }
 0x127   : > { %4834 = vst [vmem:[#allocation34_spill] sm:$0xff] %v4318_v60  ;;  %2095 = vmatmul.bf16.gmra.mxu0 %v4307_v12  ;;  %v608_v59 = vrot.slane %v606_v34, 4  ;;  %v621_v60 = vrot.slane %v619_v46, 4  ;;  %v799_v46 = vrot.slane %v797_v40, 4 }
 0x128   : > { %v1878_v25 = vpop.f32.mrf.mxu2  ;;  %v4350_v34 = vpack.c.b16 %v975_v28, %v974_v31  ;;  %v4359_v28 = vld [vmem:[%s3582_s5 + $0x9c] sm:$0xff] }
 0x129   : > { %v1879_v18 = vadd.f32 %v1878_v25, %v1790_v43  ;;  %v1967_v17 = vpop.f32.mrf.mxu3  ;;  %v1036_v43 = vunpack.c.l.b16 %v791_v15  ;;  %v617_v25 = vrot.slane %v615_v58, 5  ;;  %v612_v9 = vor.u32 %v611_v56, %v608_v59  ;;  %4838 = vst [vmem:[#allocation38_spill] sm:$0xff] %v4359_v28 }
 0x12a   : > { %v1791_v61 = vpop.f32.mrf.mxu1  ;;  %v2801_v58 = vrot.slane %v4275_v35, 9  ;;  %v3237_v35 = vld [vmem:[%s4781_s1 + $0x180] sm:$0xff] }
 0x12b   : > { %v1968_v32 = vadd.f32 %v1967_v17, %v1879_v18  ;;  %v1792_v33 = vadd.f32 %v1791_v61, %v4146_v5  ;;  %v4344_v18 = vld [vmem:[%s3582_s5 + $0xb0] sm:$0x1]  ;;  %v4346_v17 = vpack.c.b16 %v1037_v51, %v1036_v43  ;;  %v622_v55 = vor.u32 %v621_v60, %v617_v25  ;;  %2217 = vmatpush.bf16.msra.mxu2 %v3237_v35 }
 0x12c   : > { %v2058_v53 = vpop.f32.mrf.mxu0  ;;  %v625_v15 = vshll.u32 %v4344_v18, 16  ;;  %v613_v2 = vrot.slane %v612_v9, 4  ;;  %v798_v51 = vsel %vm3765_vm5, %v2801_v58, %v797_v40  ;;  %v630_v9 = vshrl.u32 %v4371_v22, 16  ;;  %v3229_v58 = vld [vmem:[%s4781_s1 + $0x140] sm:$0xff] }
 0x12d   : > { %v4341_v14 = vadd.f32 %v2056_v42, %v1968_v32  ;;  %v800_v32 = vrot.slane %v4303_v6, 5  ;;  %v623_v60 = vrot.slane %v622_v55, 4  ;;  %v3245_v6 = vld [vmem:[%s4781_s1 + $0x1c0] sm:$0xff]  ;;  %v633_v55 = vshll.u32 %v4371_v22, 16  ;;  %2128 = vmatpush.bf16.msra.mxu1 %v3229_v58 }
 0x12e   : > { %2306 = vmatpush.bf16.msra.mxu3 %v3245_v6  ;;  %v632_v35 = vrot.slane %v630_v9, 4 }
 0x12f   : > { %4836 = vst [vmem:[#allocation36_spill] sm:$0xff] %v4341_v14  ;;  %v635_v6 = vrot.slane %v633_v55, 5 }
 0x130   : > { %v1880_v5 = vpop.f32.mrf.mxu2 }
 0x131   : > { %v1881_v26 = vadd.f32 %v1880_v5, %v1792_v33  ;;  %v1969_v61 = vpop.f32.mrf.mxu3  ;;  %v627_v33 = vrot.slane %v625_v15, 5  ;;  %v801_v5 = vsel %vm3765_vm5, %v799_v46, %v800_v32  ;;  %v1038_v46 = vunpack.c.l.b16 %v798_v51 }
 0x132   : > { %v1794_v44 = vpop.f32.mrf.mxu1  ;;  %v1039_v32 = vunpack.c.l.b16 %v801_v5  ;;  %v804_v5 = vrot.slane %v4326_v8, 5  ;;  %v4412_v8 = vld [vmem:[%s3582_s5 + $0xa8] sm:$0xff] }
 0x133   : > { %v1970_v42 = vadd.f32 %v1969_v61, %v1881_v26  ;;  %v1795_v31 = vadd.f32 %v1794_v44, %v3942_v23  ;;  %v618_v26 = vsel %vm3760_vm4, %v613_v2, %v617_v25  ;;  %v628_v23 = vsel %vm3760_vm4, %v623_v60, %v627_v33  ;;  %v3253_v25 = vld [vmem:[%s4781_s1 + $0x200] sm:$0xff] }
 0x134   : > { %v2061_v19 = vpop.f32.mrf.mxu0  ;;  %v976_v2 = vunpack.c.l.b16 %v618_v26  ;;  %v977_v60 = vunpack.c.l.b16 %v628_v23  ;;  %2395 = vmatpush.bf16.msra.mxu0 %v3253_v25  ;;  %v4400_v51 = vpack.c.b16 %v1039_v32, %v1038_v46  ;;  %v4419_v46 = vld [vmem:[%s3582_s5 + $0xc0] sm:$0xf] }
 0x135   : > { %1833 = vmatmul.bf16.gmra.mxu1 %v4307_v12  ;;  %1922 = vmatmul.bf16.gmra.mxu2 %v4346_v17  ;;  %v4356_v16 = vadd.f32 %v2058_v53, %v1970_v42  ;;  %v4374_v53 = vld [vmem:[%s3582_s5 + $0xb8] sm:$0xf]  ;;  %4840 = vst [vmem:[#allocation40_spill] sm:$0xff] %v4419_v46 }
 0x136   : > { %2011 = vmatmul.bf16.gmra.mxu3 %v4359_v28  ;;  %v639_v40 = vshll.u32 %v4374_v53, 16  ;;  %v643_v15 = vshrl.u32 %v4374_v53, 16  ;;  %v4403_v23 = vpack.c.b16 %v977_v60, %v976_v2 }
 0x137   : > { %4837 = vst [vmem:[#allocation37_spill] sm:$0xff] %v4356_v16  ;;  %2100 = vmatmul.bf16.gmra.mxu0 %v4350_v34 }
 0x138   : > { %v1883_v43 = vpop.f32.mrf.mxu2 }
 0x139   : > { %v1884_v59 = vadd.f32 %v1883_v43, %v1795_v31  ;;  %v1972_v56 = vpop.f32.mrf.mxu3  ;;  %v641_v31 = vrot.slane %v639_v40, 5  ;;  %v645_v43 = vrot.slane %v643_v15, 4 }
 0x13a   : > { %v1796_v61 = vpop.f32.mrf.mxu1 }
 0x13b   : > { %v1973_v44 = vadd.f32 %v1972_v56, %v1884_v59  ;;  %v1797_v59 = vadd.f32 %v1796_v61, %v3974_v39  ;;  %v4398_v56 = vld [vmem:[%s3582_s5 + $0xbc] sm:$0x1]  ;;  %v646_v9 = vor.u32 %v645_v43, %v641_v31  ;;  %v806_v61 = vrot.slane %v804_v5, 4 }
 0x13c   : > { %v2063_v42 = vpop.f32.mrf.mxu0  ;;  %v649_v55 = vshll.u32 %v4398_v56, 16  ;;  %v817_v43 = vshrl.u32 %v4419_v46, 16 }
 0x13d   : > { %v4394_v33 = vadd.f32 %v2061_v19, %v1973_v44  ;;  %v636_v19 = vor.u32 %v635_v6, %v632_v35  ;;  %v807_v44 = vrot.slane %v4344_v18, 5 }
 0x13e   : > { %v651_v58 = vrot.slane %v649_v55, 5 }
 0x13f   : > { %v808_v6 = vsel %vm3765_vm5, %v806_v61, %v807_v44  ;;  %v819_v44 = vrot.slane %v817_v43, 4 }
 0x140   : > { %v1885_v16 = vpop.f32.mrf.mxu2 }
 0x141   : > { %v1886_v14 = vadd.f32 %v1885_v16, %v1797_v59  ;;  %v1974_v28 = vpop.f32.mrf.mxu3  ;;  %v2802_v16 = vrot.slane %v4316_v45, 9  ;;  %v4422_v45 = vld [vmem:[%s3582_s5 + $0xc4] sm:$0xf] }
 0x142   : > { %v1799_v26 = vpop.f32.mrf.mxu1 }
 0x143   : > { %v1975_v40 = vadd.f32 %v1974_v28, %v1886_v14  ;;  %v637_v14 = vrot.slane %v636_v19, 4  ;;  %v647_v28 = vrot.slane %v646_v9, 4  ;;  %v1800_v25 = vadd.f32 %v1799_v26, %v4003_v27 }
 0x144   : > { %v2066_v39 = vpop.f32.mrf.mxu0  ;;  %v805_v60 = vsel %vm3765_vm5, %v2802_v16, %v804_v5  ;;  %v820_v19 = vshll.u32 %v4419_v46, 16  ;;  %v826_v9 = vshll.u32 %v4422_v45, 16  ;;  %v830_v5 = vshrl.u32 %v4422_v45, 16 }
 0x145   : > { %1838 = vmatmul.bf16.gmra.mxu1 %v4350_v34  ;;  %1927 = vmatmul.bf16.gmra.mxu2 %v4400_v51  ;;  %v4409_v15 = vadd.f32 %v2063_v42, %v1975_v40  ;;  %v642_v18 = vsel %vm3760_vm4, %v637_v14, %v641_v31  ;;  %v652_v27 = vsel %vm3760_vm4, %v647_v28, %v651_v58  ;;  %v1040_v55 = vunpack.c.l.b16 %v805_v60 }
 0x146   : > { %2016 = vmatmul.bf16.gmra.mxu3 %v4412_v8  ;;  %v1041_v40 = vunpack.c.l.b16 %v808_v6  ;;  %v978_v61 = vunpack.c.l.b16 %v642_v18  ;;  %v979_v31 = vunpack.c.l.b16 %v652_v27  ;;  %v822_v28 = vrot.slane %v820_v19, 5  ;;  %v4453_v19 = vld [vmem:[%s3582_s5 + $0xb4] sm:$0xff] }
 0x147   : > { %4839 = vst [vmem:[#allocation39_spill] sm:$0xff] %v4409_v15  ;;  %2105 = vmatmul.bf16.gmra.mxu0 %v4403_v23  ;;  %v828_v58 = vrot.slane %v826_v9, 5  ;;  %v814_v9 = vrot.slane %v4398_v56, 5 }
 0x148   : > { %v1888_v32 = vpop.f32.mrf.mxu2  ;;  %v4442_v15 = vpack.c.b16 %v1041_v40, %v1040_v55  ;;  %v4444_v6 = vpack.c.b16 %v979_v31, %v978_v61  ;;  %v823_v43 = vor.u32 %v822_v28, %v819_v44 }
 0x149   : > { %v1889_v42 = vadd.f32 %v1888_v32, %v1800_v25  ;;  %v1977_v2 = vpop.f32.mrf.mxu3  ;;  %v832_v25 = vrot.slane %v830_v5, 4 }
 0x14a   : > { %v1801_v35 = vpop.f32.mrf.mxu1  ;;  %v824_v55 = vrot.slane %v823_v43, 4 }
 0x14b   : > { %v1978_v59 = vadd.f32 %v1977_v2, %v1889_v42  ;;  %v1802_v14 = vadd.f32 %v1801_v35, %v4034_v1  ;;  %v4440_v42 = vld [vmem:[%s3582_s5 + $0xc8] sm:$0x1]  ;;  %v833_v1 = vor.u32 %v832_v25, %v828_v58 }
 0x14c   : > { %v2068_v26 = vpop.f32.mrf.mxu0  ;;  %v836_v35 = vshll.u32 %v4440_v42, 16  ;;  %v829_v56 = vsel %vm3760_vm4, %v824_v55, %v828_v58 }
 0x14d   : > { %v4436_v16 = vadd.f32 %v2066_v39, %v1978_v59  ;;  %v811_v39 = vrot.slane %v4374_v53, 5  ;;  %v2803_v53 = vrot.slane %v4371_v22, 9  ;;  %v834_v40 = vrot.slane %v833_v1, 4 }
 0x14e   : > { %v838_v61 = vrot.slane %v836_v35, 5  ;;  %v1080_v43 = vunpack.c.l.b16 %v829_v56 }
 0x14f   : > { %v812_v28 = vsel %vm3765_vm5, %v2803_v53, %v811_v39 }
 0x150   : > { %v1890_v32 = vpop.f32.mrf.mxu2 }
 0x151   : > { %v1891_v2 = vadd.f32 %v1890_v32, %v1802_v14  ;;  %v1979_v46 = vpop.f32.mrf.mxu3 }
 0x152   : > { %v1804_v60 = vpop.f32.mrf.mxu1 }
 0x153   : > { %v1980_v18 = vadd.f32 %v1979_v46, %v1891_v2  ;;  %v813_v46 = vrot.slane %v811_v39, 4  ;;  %v1805_v5 = vadd.f32 %v1804_v60, %v4053_v13  ;;  %v839_v13 = vsel %vm3760_vm4, %v834_v40, %v838_v61 }
 0x154   : > { %v2071_v27 = vpop.f32.mrf.mxu0  ;;  %v1042_v2 = vunpack.c.l.b16 %v812_v28  ;;  %v1081_v1 = vunpack.c.l.b16 %v839_v13 }
 0x155   : > { %1843 = vmatmul.bf16.gmra.mxu1 %v4403_v23  ;;  %1932 = vmatmul.bf16.gmra.mxu2 %v4442_v15  ;;  %v4450_v59 = vadd.f32 %v2068_v26, %v1980_v18  ;;  %v815_v25 = vsel %vm3765_vm5, %v813_v46, %v814_v9 }
 0x156   : > { %2021 = vmatmul.bf16.gmra.mxu3 %v4453_v19  ;;  %v1043_v60 = vunpack.c.l.b16 %v815_v25  ;;  %v4476_v58 = vpack.c.b16 %v1081_v1, %v1080_v43 }
 0x157   : > { %2110 = vmatmul.bf16.gmra.mxu0 %v4444_v6 }
 0x158   : > { %v1893_v31 = vpop.f32.mrf.mxu2  ;;  %v4471_v9 = vpack.c.b16 %v1043_v60, %v1042_v2 }
 0x159   : > { %v1894_v44 = vadd.f32 %v1893_v31, %v1805_v5  ;;  %v1982_v26 = vpop.f32.mrf.mxu3  ;;  %v4474_v31 = vld [vmem:[%s3582_s5 + $0xc0] sm:$0xff] }
 0x15a   : > { %v1806_v14 = vpop.f32.mrf.mxu1 }
 0x15b   : > { %v1983_v22 = vadd.f32 %v1982_v26, %v1894_v44  ;;  %v1807_v39 = vadd.f32 %v1806_v14, %v4089_v7 }
 0x15c   : > { %v2073_v32 = vpop.f32.mrf.mxu0 }
 0x15d   : > { %v4468_v18 = vadd.f32 %v2071_v27, %v1983_v22 }
 0x160   : > { %v1895_v35 = vpop.f32.mrf.mxu2 }
 0x161   : > { %v1896_v53 = vadd.f32 %v1895_v35, %v1807_v39  ;;  %v1984_v46 = vpop.f32.mrf.mxu3 }
 0x162   : > { %v1809_v5 = vpop.f32.mrf.mxu1 }
 0x163   : > { %v1985_v55 = vadd.f32 %v1984_v46, %v1896_v53  ;;  %v1810_v7 = vadd.f32 %v1809_v5, %v4113_v20  ;;  %v3344_v20 = vld [vmem:[%s3582_s5 + $0x18] sm:$0xff] }
 0x164   : > { %v2076_v40 = vpop.f32.mrf.mxu0 }
 0x165   : > { %1848 = vmatmul.bf16.gmra.mxu1 %v4444_v6  ;;  %1937 = vmatmul.bf16.gmra.mxu2 %v4471_v9  ;;  %v4480_v27 = vadd.f32 %v2073_v32, %v1985_v55 }
 0x166   : > { %2026 = vmatmul.bf16.gmra.mxu3 %v4474_v31 }
 0x167   : > { %2115 = vmatmul.bf16.gmra.mxu0 %v4476_v58 }
 0x168   : > { %v1898_v61 = vpop.f32.mrf.mxu2 }
 0x169   : > { %v1899_v44 = vadd.f32 %v1898_v61, %v1810_v7  ;;  %v1987_v26 = vpop.f32.mrf.mxu3 }
 0x16a   : > { %v1811_v14 = vpop.f32.mrf.mxu1 }
 0x16b   : > { %v1988_v28 = vadd.f32 %v1987_v26, %v1899_v44  ;;  %v1812_v56 = vadd.f32 %v1811_v14, %v4136_v30 }
 0x16c   : > { %v2078_v25 = vpop.f32.mrf.mxu0 }
 0x16d   : > { %v4485_v22 = vadd.f32 %v2076_v40, %v1988_v28 }
 0x170   : > { %v1900_v13 = vpop.f32.mrf.mxu2 }
 0x171   : > { %v1901_v32 = vadd.f32 %v1900_v13, %v1812_v56  ;;  %v1989_v2 = vpop.f32.mrf.mxu3 }
 0x172   : > { %v1814_v60 = vpop.f32.mrf.mxu1 }
 0x173   : > { %v1990_v43 = vadd.f32 %v1989_v2, %v1901_v32  ;;  %v1815_v35 = vadd.f32 %v1814_v60, %v3961_v57  ;;  %v3345_v57 = vld [vmem:[%s3582_s5 + $0x24] sm:$0xff] }
 0x174   : > { %v2081_v1 = vpop.f32.mrf.mxu0 }
 0x175   : > { %2129 = vmatmul.bf16.vlgmr.msra.gmra.mxu1 %v3831_v49  ;;  %2218 = vmatmul.bf16.vlgmr.msra.gmra.mxu2 %v3344_v20  ;;  %v4490_v39 = vadd.f32 %v2078_v25, %v1990_v43 }
 0x176   : > { %2307 = vmatmul.bf16.vlgmr.msra.gmra.mxu3 %v3834_v52 }
 0x177   : > { %2396 = vmatmul.bf16.vlgmr.msra.gmra.mxu0 %v3863_v63 }
 0x178   : > { %v1903_v30 = vpop.f32.mrf.mxu2 }
 0x179   : > { %v1904_v53 = vadd.f32 %v1903_v30, %v1815_v35  ;;  %v1992_v46 = vpop.f32.mrf.mxu3 }
 0x17a   : > { %v1816_v5 = vpop.f32.mrf.mxu1 }
 0x17b   : > { %v1993_v55 = vadd.f32 %v1992_v46, %v1904_v53  ;;  %v1817_v49 = vadd.f32 %v1816_v5, %v3993_v62 }
 0x17c   : > { %v2083_v40 = vpop.f32.mrf.mxu0 }
 0x17d   : > { %v4495_v7 = vadd.f32 %v2081_v1, %v1993_v55 }
 0x180   : > { %v1905_v61 = vpop.f32.mrf.mxu2 }
 0x181   : > { %v1906_v44 = vadd.f32 %v1905_v61, %v1817_v49  ;;  %v1994_v26 = vpop.f32.mrf.mxu3 }
 0x182   : > { %v1819_v14 = vpop.f32.mrf.mxu1 }
 0x183   : > { %v1995_v52 = vadd.f32 %v1994_v26, %v1906_v44  ;;  %v1820_v56 = vadd.f32 %v1819_v14, %v4022_v54  ;;  %v3346_v54 = vld [vmem:[%s3582_s5 + $0x30] sm:$0xff] }
 0x184   : > { %v2086_v28 = vpop.f32.mrf.mxu0 }
 0x185   : > { %2134 = vmatmul.bf16.gmra.mxu1 %v3863_v63  ;;  %2223 = vmatmul.bf16.gmra.mxu2 %v3345_v57  ;;  %v4500_v25 = vadd.f32 %v2083_v40, %v1995_v52 }
 0x186   : > { %2312 = vmatmul.bf16.gmra.mxu3 %v3865_v21 }
 0x187   : > { %2401 = vmatmul.bf16.gmra.mxu0 %v3907_v38 }
 0x188   : > { %v1908_v62 = vpop.f32.mrf.mxu2 }
 0x189   : > { %v1909_v13 = vadd.f32 %v1908_v62, %v1820_v56  ;;  %v1997_v32 = vpop.f32.mrf.mxu3 }
 0x18a   : > { %v1821_v2 = vpop.f32.mrf.mxu1 }
 0x18b   : > { %v1998_v60 = vadd.f32 %v1997_v32, %v1909_v13  ;;  %v1822_v63 = vadd.f32 %v1821_v2, %v4045_v10  ;;  %v4841_v32 = vld [vmem:[#allocation11_spill] sm:$0xff]  ;;  %v4842_v2 = vld [vmem:[#allocation21_spill] sm:$0xff] }
 0x18c   : > { %v2088_v43 = vpop.f32.mrf.mxu0 }
 0x18d   : > { %v4505_v1 = vadd.f32 %v2086_v28, %v1998_v60 }
 0x190   : > { %v1910_v20 = vpop.f32.mrf.mxu2 }
 0x191   : > { %v1911_v35 = vadd.f32 %v1910_v20, %v1822_v63  ;;  %v1999_v30 = vpop.f32.mrf.mxu3 }
 0x192   : > { %v1824_v53 = vpop.f32.mrf.mxu1 }
 0x193   : > { %v2000_v21 = vadd.f32 %v1999_v30, %v1911_v35  ;;  %v1825_v55 = vadd.f32 %v1824_v53, %v4077_v24  ;;  %v3347_v24 = vld [vmem:[%s3582_s5 + $0x3c] sm:$0xff] }
 0x194   : > { %v2091_v46 = vpop.f32.mrf.mxu0 }
 0x195   : > { %2139 = vmatmul.bf16.gmra.mxu1 %v3907_v38  ;;  %2228 = vmatmul.bf16.gmra.mxu2 %v3346_v54  ;;  %v4510_v5 = vadd.f32 %v2088_v43, %v2000_v21 }
 0x196   : > { %2317 = vmatmul.bf16.gmra.mxu3 %v3910_v4 }
 0x197   : > { %2406 = vmatmul.bf16.gmra.mxu0 %v3939_v36 }
 0x198   : > { %v1913_v10 = vpop.f32.mrf.mxu2 }
 0x199   : > { %v1914_v40 = vadd.f32 %v1913_v10, %v1825_v55  ;;  %v2002_v49 = vpop.f32.mrf.mxu3 }
 0x19a   : > { %v1826_v61 = vpop.f32.mrf.mxu1 }
 0x19b   : > { %v2003_v44 = vadd.f32 %v2002_v49, %v1914_v40  ;;  %v1827_v38 = vadd.f32 %v1826_v61, %v4106_v48  ;;  %v3348_v49 = vld [vmem:[%s3582_s5 + $0x48] sm:$0xff] }
 0x19c   : > { %v2093_v26 = vpop.f32.mrf.mxu0 }
 0x19d   : > { %v4515_v14 = vadd.f32 %v2091_v46, %v2003_v44  ;;  %v4844_v44 = vld [vmem:[#allocation12_spill] sm:$0xff] }
 0x1a0   : > { %v1915_v52 = vpop.f32.mrf.mxu2 }
 0x1a1   : > { %v1916_v28 = vadd.f32 %v1915_v52, %v1827_v38  ;;  %v2004_v57 = vpop.f32.mrf.mxu3  ;;  %v4846_v38 = vld [vmem:[#allocation9_spill] sm:$0xff] }
 0x1a2   : > { %v1829_v56 = vpop.f32.mrf.mxu1 }
 0x1a3   : > { %v2005_v4 = vadd.f32 %v2004_v57, %v1916_v28  ;;  %v1830_v60 = vadd.f32 %v1829_v56, %v4842_v2 }
 0x1a4   : > { %v2096_v62 = vpop.f32.mrf.mxu0 }
 0x1a5   : > { %2144 = vmatmul.bf16.gmra.mxu1 %v3939_v36  ;;  %2233 = vmatmul.bf16.gmra.mxu2 %v3347_v24  ;;  %v4520_v13 = vadd.f32 %v2093_v26, %v2005_v4  ;;  %v4843_v36 = vld [vmem:[#allocation23_spill] sm:$0xff] }
 0x1a6   : > { %2322 = vmatmul.bf16.gmra.mxu3 %v3944_v41  ;;  %v4845_v26 = vld [vmem:[#allocation15_spill] sm:$0xff] }
 0x1a7   : > { %2411 = vmatmul.bf16.gmra.mxu0 %v4841_v32 }
 0x1a8   : > { %v1918_v48 = vpop.f32.mrf.mxu2 }
 0x1a9   : > { %v1919_v43 = vadd.f32 %v1918_v48, %v1830_v60  ;;  %v2007_v63 = vpop.f32.mrf.mxu3 }
 0x1aa   : > { %v1831_v20 = vpop.f32.mrf.mxu1 }
 0x1ab   : > { %v2008_v35 = vadd.f32 %v2007_v63, %v1919_v43  ;;  %v1832_v21 = vadd.f32 %v1831_v20, %v4843_v36  ;;  %v3349_v36 = vld [vmem:[%s3582_s5 + $0x54] sm:$0xff] }
 0x1ac   : > { %v2098_v30 = vpop.f32.mrf.mxu0 }
 0x1ad   : > { %v4525_v53 = vadd.f32 %v2096_v62, %v2008_v35 }
 0x1b0   : > { %v1920_v46 = vpop.f32.mrf.mxu2 }
 0x1b1   : > { %v1921_v54 = vadd.f32 %v1920_v46, %v1832_v21  ;;  %v2009_v55 = vpop.f32.mrf.mxu3  ;;  %v4848_v46 = vld [vmem:[#allocation16_spill] sm:$0xff] }
 0x1b2   : > { %v1834_v10 = vpop.f32.mrf.mxu1 }
 0x1b3   : > { %v2010_v41 = vadd.f32 %v2009_v55, %v1921_v54  ;;  %v1835_v52 = vadd.f32 %v1834_v10, %v4846_v38  ;;  %v4849_v54 = vld [vmem:[#allocation19_spill] sm:$0xff]  ;;  %v4850_v55 = vld [vmem:[#allocation13_spill] sm:$0xff] }
 0x1b4   : > { %v2101_v40 = vpop.f32.mrf.mxu0 }
 0x1b5   : > { %2149 = vmatmul.bf16.gmra.mxu1 %v4841_v32  ;;  %2238 = vmatmul.bf16.gmra.mxu2 %v3348_v49  ;;  %v4530_v61 = vadd.f32 %v2098_v30, %v2010_v41  ;;  %v4847_v32 = vld [vmem:[#allocation10_spill] sm:$0xff] }
 0x1b6   : > { %2327 = vmatmul.bf16.gmra.mxu3 %v4844_v44 }
 0x1b7   : > { %2416 = vmatmul.bf16.gmra.mxu0 %v4845_v26 }
 0x1b8   : > { %v1923_v28 = vpop.f32.mrf.mxu2 }
 0x1b9   : > { %v1924_v57 = vadd.f32 %v1923_v28, %v1835_v52  ;;  %v2012_v56 = vpop.f32.mrf.mxu3 }
 0x1ba   : > { %v1836_v4 = vpop.f32.mrf.mxu1 }
 0x1bb   : > { %v2013_v62 = vadd.f32 %v2012_v56, %v1924_v57  ;;  %v1837_v60 = vadd.f32 %v1836_v4, %v4847_v32 }
 0x1bc   : > { %v2103_v24 = vpop.f32.mrf.mxu0 }
 0x1bd   : > { %v4535_v2 = vadd.f32 %v2101_v40, %v2013_v62 }
 0x1c0   : > { %v1925_v48 = vpop.f32.mrf.mxu2 }
 0x1c1   : > { %v1926_v43 = vadd.f32 %v1925_v48, %v1837_v60  ;;  %v2014_v63 = vpop.f32.mrf.mxu3  ;;  %v3350_v48 = vld [vmem:[%s3582_s5 + $0x60] sm:$0xff] }
 0x1c2   : > { %v1839_v20 = vpop.f32.mrf.mxu1 }
 0x1c3   : > { %v2015_v35 = vadd.f32 %v2014_v63, %v1926_v43  ;;  %v1840_v10 = vadd.f32 %v1839_v20, %v4850_v55  ;;  %v4852_v63 = vld [vmem:[#allocation20_spill] sm:$0xff]  ;;  %v4853_v20 = vld [vmem:[#allocation25_spill] sm:$0xff] }
 0x1c4   : > { %v2106_v30 = vpop.f32.mrf.mxu0 }
 0x1c5   : > { %2154 = vmatmul.bf16.gmra.mxu1 %v4845_v26  ;;  %2243 = vmatmul.bf16.gmra.mxu2 %v3349_v36  ;;  %v4540_v21 = vadd.f32 %v2103_v24, %v2015_v35  ;;  %v4851_v26 = vld [vmem:[#allocation14_spill] sm:$0xff]  ;;  %v4854_v35 = vld [vmem:[#allocation17_spill] sm:$0xff] }
 0x1c6   : > { %2332 = vmatmul.bf16.gmra.mxu3 %v4848_v46 }
 0x1c7   : > { %2421 = vmatmul.bf16.gmra.mxu0 %v4849_v54 }
 0x1c8   : > { %v1928_v41 = vpop.f32.mrf.mxu2 }
 0x1c9   : > { %v1929_v40 = vadd.f32 %v1928_v41, %v1840_v10  ;;  %v2017_v49 = vpop.f32.mrf.mxu3 }
 0x1ca   : > { %v1841_v44 = vpop.f32.mrf.mxu1 }
 0x1cb   : > { %v2018_v38 = vadd.f32 %v2017_v49, %v1929_v40  ;;  %v1842_v57 = vadd.f32 %v1841_v44, %v4851_v26 }
 0x1cc   : > { %v2108_v52 = vpop.f32.mrf.mxu0 }
 0x1cd   : > { %v4545_v28 = vadd.f32 %v2106_v30, %v2018_v38 }
 0x1d0   : > { %v1930_v56 = vpop.f32.mrf.mxu2 }
 0x1d1   : > { %v1931_v4 = vadd.f32 %v1930_v56, %v1842_v57  ;;  %v2019_v62 = vpop.f32.mrf.mxu3 }
 0x1d2   : > { %v1844_v24 = vpop.f32.mrf.mxu1 }
 0x1d3   : > { %v2020_v32 = vadd.f32 %v2019_v62, %v1931_v4  ;;  %v1845_v30 = vadd.f32 %v1844_v24, %v4854_v35  ;;  %v3351_v62 = vld [vmem:[%s3582_s5 + $0x6c] sm:$0xff] }
 0x1d4   : > { %v2111_v60 = vpop.f32.mrf.mxu0 }
 0x1d5   : > { %2159 = vmatmul.bf16.gmra.mxu1 %v4849_v54  ;;  %2248 = vmatmul.bf16.gmra.mxu2 %v3350_v48  ;;  %v4550_v43 = vadd.f32 %v2108_v52, %v2020_v32  ;;  %v4855_v54 = vld [vmem:[#allocation18_spill] sm:$0xff]  ;;  %v4857_v48 = vld [vmem:[#allocation28_spill] sm:$0xff] }
 0x1d6   : > { %2337 = vmatmul.bf16.gmra.mxu3 %v4852_v63  ;;  %v4856_v32 = vld [vmem:[#allocation26_spill] sm:$0xff] }
 0x1d7   : > { %2426 = vmatmul.bf16.gmra.mxu0 %v4853_v20 }
 0x1d8   : > { %v1933_v36 = vpop.f32.mrf.mxu2 }
 0x1d9   : > { %v1934_v46 = vadd.f32 %v1933_v36, %v1845_v30  ;;  %v2022_v55 = vpop.f32.mrf.mxu3 }
 0x1da   : > { %v1846_v10 = vpop.f32.mrf.mxu1 }
 0x1db   : > { %v2023_v41 = vadd.f32 %v2022_v55, %v1934_v46  ;;  %v1847_v44 = vadd.f32 %v1846_v10, %v4855_v54 }
 0x1dc   : > { %v2113_v40 = vpop.f32.mrf.mxu0 }
 0x1dd   : > { %v4555_v49 = vadd.f32 %v2111_v60, %v2023_v41  ;;  %v4858_v60 = vld [vmem:[#allocation22_spill] sm:$0xff] }
 0x1e0   : > { %v1935_v38 = vpop.f32.mrf.mxu2 }
 0x1e1   : > { %v1936_v52 = vadd.f32 %v1935_v38, %v1847_v44  ;;  %v2024_v26 = vpop.f32.mrf.mxu3 }
 0x1e2   : > { %v1849_v57 = vpop.f32.mrf.mxu1 }
 0x1e3   : > { %v2025_v56 = vadd.f32 %v2024_v26, %v1936_v52  ;;  %v1850_v63 = vadd.f32 %v1849_v57, %v4858_v60  ;;  %v4860_v57 = vld [vmem:[#allocation30_spill] sm:$0xff] }
 0x1e4   : > { %v2116_v4 = vpop.f32.mrf.mxu0 }
 0x1e5   : > { %2164 = vmatmul.bf16.gmra.mxu1 %v4853_v20  ;;  %2253 = vmatmul.bf16.gmra.mxu2 %v3351_v62  ;;  %v4560_v24 = vadd.f32 %v2113_v40, %v2025_v56  ;;  %v4859_v20 = vld [vmem:[#allocation24_spill] sm:$0xff] }
 0x1e6   : > { %2342 = vmatmul.bf16.gmra.mxu3 %v4856_v32 }
 0x1e7   : > { %2431 = vmatmul.bf16.gmra.mxu0 %v4857_v48 }
 0x1e8   : > { %v1938_v35 = vpop.f32.mrf.mxu2 }
 0x1e9   : > { %v1939_v30 = vadd.f32 %v1938_v35, %v1850_v63  ;;  %v2027_v36 = vpop.f32.mrf.mxu3 }
 0x1ea   : > { %v1851_v46 = vpop.f32.mrf.mxu1 }
 0x1eb   : > { %v2028_v55 = vadd.f32 %v2027_v36, %v1939_v30  ;;  %v1852_v54 = vadd.f32 %v1851_v46, %v4859_v20 }
 0x1ec   : > { %v2118_v10 = vpop.f32.mrf.mxu0 }
 0x1ed   : > { %v4565_v41 = vadd.f32 %v2116_v4, %v2028_v55  ;;  %v4861_v4 = vld [vmem:[#allocation27_spill] sm:$0xff] }
 0x1f0   : > { %v1940_v44 = vpop.f32.mrf.mxu2 }
 0x1f1   : > { %v1941_v40 = vadd.f32 %v1940_v44, %v1852_v54  ;;  %v2029_v38 = vpop.f32.mrf.mxu3 }
 0x1f2   : > { %v2130_v52 = vpop.f32.mrf.mxu1 }
 0x1f3   : > { %v2030_v26 = vadd.f32 %v2029_v38, %v1941_v40  ;;  %v2131_v32 = vadd.f32 %v2130_v52, %v4861_v4  ;;  %v4863_v4 = vld [vmem:[#allocation31_spill] sm:$0xff] }
 0x1f4   : > { %v2397_v56 = vpop.f32.mrf.mxu0 }
 0x1f5   : > { %2169 = vmatmul.bf16.gmra.mxu1 %v4857_v48  ;;  %2258 = vmatmul.bf16.gmra.mxu2 %v4860_v57  ;;  %v4570_v62 = vadd.f32 %v2118_v10, %v2030_v26 }
 0x1f6   : > { %2347 = vmatmul.bf16.gmra.mxu3 %v4212_v50  ;;  %v4862_v50 = vld [vmem:[#allocation29_spill] sm:$0xff] }
 0x1f7   : > { %2436 = vmatmul.bf16.gmra.mxu0 %v4250_v11 }
 0x1f8   : > { %v2219_v60 = vpop.f32.mrf.mxu2 }
 0x1f9   : > { %v2220_v63 = vadd.f32 %v2219_v60, %v2131_v32  ;;  %v2308_v35 = vpop.f32.mrf.mxu3 }
 0x1fa   : > { %v2132_v30 = vpop.f32.mrf.mxu1 }
 0x1fb   : > { %v2309_v36 = vadd.f32 %v2308_v35, %v2220_v63  ;;  %v2133_v55 = vadd.f32 %v2132_v30, %v4862_v50 }
 0x1fc   : > { %v2399_v48 = vpop.f32.mrf.mxu0 }
 0x1fd   : > { %v2398_v46 = vadd.f32 %v2397_v56, %v2309_v36 }
 0x1ff   : > { %2477 = vst [vmem:[%s4579_s23] sm:$0xff] %v2398_v46  ;;  %v2547_v26 = vmul.f32 %v2398_v46, %v2398_v46 }
 0x200   : > { %v2221_v10 = vpop.f32.mrf.mxu2 }
 0x201   : > { %v2222_v20 = vadd.f32 %v2221_v10, %v2133_v55  ;;  %v2310_v54 = vpop.f32.mrf.mxu3  ;;  %v4864_v55 = vld [vmem:[#allocation32_spill] sm:$0xff] }
 0x202   : > { %v2135_v44 = vpop.f32.mrf.mxu1 }
 0x203   : > { %v2311_v40 = vadd.f32 %v2310_v54, %v2222_v20  ;;  %v2136_v32 = vadd.f32 %v2135_v44, %v4863_v4 }
 0x204   : > { %v2402_v38 = vpop.f32.mrf.mxu0 }
 0x205   : > { %v2400_v52 = vadd.f32 %v2399_v48, %v2311_v40  ;;  %2174 = vmatmul.bf16.gmra.mxu1 %v4250_v11  ;;  %2263 = vmatmul.bf16.gmra.mxu2 %v4264_v47 }
 0x206   : > { %2352 = vmatmul.bf16.gmra.mxu3 %v4253_v3 }
 0x207   : > { %2441 = vmatmul.bf16.gmra.mxu0 %v4305_v0  ;;  %2478 = vst [vmem:[%s4579_s23 + $0x8] sm:$0xff] %v2400_v52  ;;  %v2509_v56 = vadd.f32 %v2400_v52, %v2398_v46  ;;  %v2548_v57 = vmul.f32 %v2400_v52, %v2400_v52 }
 0x208   : > { %v2224_v60 = vpop.f32.mrf.mxu2 }
 0x209   : > { %v2579_v63 = vadd.f32 %v2548_v57, %v2547_v26  ;;  %v2225_v35 = vadd.f32 %v2224_v60, %v2136_v32  ;;  %v2313_v30 = vpop.f32.mrf.mxu3  ;;  %v4865_v57 = vld [vmem:[#allocation35_spill] sm:$0xff]  ;;  %v4866_v32 = vld [vmem:[#allocation33_spill] sm:$0xff] }
 0x20a   : > { %v2137_v36 = vpop.f32.mrf.mxu1 }
 0x20b   : > { %v2314_v48 = vadd.f32 %v2313_v30, %v2225_v35  ;;  %v2138_v10 = vadd.f32 %v2137_v36, %v4864_v55 }
 0x20c   : > { %v2404_v11 = vpop.f32.mrf.mxu0 }
 0x20d   : > { %v2403_v50 = vadd.f32 %v2402_v38, %v2314_v48 }
 0x20f   : > { %2479 = vst [vmem:[%s4579_s23 + $0x10] sm:$0xff] %v2403_v50  ;;  %v2510_v47 = vadd.f32 %v2509_v56, %v2403_v50  ;;  %v2549_v3 = vmul.f32 %v2403_v50, %v2403_v50 }
 0x210   : > { %v2226_v20 = vpop.f32.mrf.mxu2 }
 0x211   : > { %v2580_v54 = vadd.f32 %v2579_v63, %v2549_v3  ;;  %v2227_v46 = vadd.f32 %v2226_v20, %v2138_v10  ;;  %v2315_v40 = vpop.f32.mrf.mxu3 }
 0x212   : > { %v2140_v52 = vpop.f32.mrf.mxu1 }
 0x213   : > { %v2316_v44 = vadd.f32 %v2315_v40, %v2227_v46  ;;  %v2141_v60 = vadd.f32 %v2140_v52, %v4866_v32 }
 0x214   : > { %v2407_v4 = vpop.f32.mrf.mxu0 }
 0x215   : > { %v2405_v26 = vadd.f32 %v2404_v11, %v2316_v44  ;;  %2179 = vmatmul.bf16.gmra.mxu1 %v4305_v0  ;;  %2268 = vmatmul.bf16.gmra.mxu2 %v4865_v57  ;;  %v4868_v57 = vld [vmem:[#allocation38_spill] sm:$0xff] }
 0x216   : > { %2357 = vmatmul.bf16.gmra.mxu3 %v4307_v12  ;;  %v4867_v12 = vld [vmem:[#allocation34_spill] sm:$0xff] }
 0x217   : > { %2446 = vmatmul.bf16.gmra.mxu0 %v4346_v17  ;;  %2480 = vst [vmem:[%s4579_s23 + $0x18] sm:$0xff] %v2405_v26  ;;  %v2511_v38 = vadd.f32 %v2510_v47, %v2405_v26  ;;  %v2550_v56 = vmul.f32 %v2405_v26, %v2405_v26 }
 0x218   : > { %v2229_v63 = vpop.f32.mrf.mxu2 }
 0x219   : > { %v2581_v35 = vadd.f32 %v2580_v54, %v2550_v56  ;;  %v2230_v30 = vadd.f32 %v2229_v63, %v2141_v60  ;;  %v2318_v36 = vpop.f32.mrf.mxu3  ;;  %v4869_v56 = vld [vmem:[#allocation36_spill] sm:$0xff] }
 0x21a   : > { %v2142_v48 = vpop.f32.mrf.mxu1 }
 0x21b   : > { %v2319_v11 = vadd.f32 %v2318_v36, %v2230_v30  ;;  %v2143_v10 = vadd.f32 %v2142_v48, %v4867_v12 }
 0x21c   : > { %v2409_v50 = vpop.f32.mrf.mxu0 }
 0x21d   : > { %v2408_v0 = vadd.f32 %v2407_v4, %v2319_v11 }
 0x21f   : > { %2481 = vst [vmem:[%s4579_s23 + $0x20] sm:$0xff] %v2408_v0  ;;  %v2512_v3 = vadd.f32 %v2511_v38, %v2408_v0  ;;  %v2551_v55 = vmul.f32 %v2408_v0, %v2408_v0 }
 0x220   : > { %v2231_v20 = vpop.f32.mrf.mxu2 }
 0x221   : > { %v2582_v46 = vadd.f32 %v2581_v35, %v2551_v55  ;;  %v2232_v47 = vadd.f32 %v2231_v20, %v2143_v10  ;;  %v2320_v40 = vpop.f32.mrf.mxu3 }
 0x222   : > { %v2145_v44 = vpop.f32.mrf.mxu1 }
 0x223   : > { %v2321_v52 = vadd.f32 %v2320_v40, %v2232_v47  ;;  %v2146_v32 = vadd.f32 %v2145_v44, %v4869_v56 }
 0x224   : > { %v2412_v26 = vpop.f32.mrf.mxu0 }
 0x225   : > { %v2410_v54 = vadd.f32 %v2409_v50, %v2321_v52  ;;  %2184 = vmatmul.bf16.gmra.mxu1 %v4346_v17  ;;  %2273 = vmatmul.bf16.gmra.mxu2 %v4868_v57 }
 0x226   : > { %2362 = vmatmul.bf16.gmra.mxu3 %v4350_v34  ;;  %v4870_v34 = vld [vmem:[#allocation37_spill] sm:$0xff] }
 0x227   : > { %2451 = vmatmul.bf16.gmra.mxu0 %v4400_v51  ;;  %2482 = vst [vmem:[%s4579_s23 + $0x28] sm:$0xff] %v2410_v54  ;;  %v2513_v4 = vadd.f32 %v2512_v3, %v2410_v54  ;;  %v2552_v38 = vmul.f32 %v2410_v54, %v2410_v54 }
 0x228   : > { %v2234_v60 = vpop.f32.mrf.mxu2 }
 0x229   : > { %v2583_v63 = vadd.f32 %v2582_v46, %v2552_v38  ;;  %v2235_v35 = vadd.f32 %v2234_v60, %v2146_v32  ;;  %v2323_v30 = vpop.f32.mrf.mxu3 }
 0x22a   : > { %v2147_v36 = vpop.f32.mrf.mxu1 }
 0x22b   : > { %v2324_v48 = vadd.f32 %v2323_v30, %v2235_v35  ;;  %v2148_v55 = vadd.f32 %v2147_v36, %v4870_v34  ;;  %v4871_v30 = vld [vmem:[#allocation39_spill] sm:$0xff] }
 0x22c   : > { %v2414_v11 = vpop.f32.mrf.mxu0 }
 0x22d   : > { %v2413_v17 = vadd.f32 %v2412_v26, %v2324_v48 }
 0x22f   : > { %2483 = vst [vmem:[%s4579_s23 + $0x30] sm:$0xff] %v2413_v17  ;;  %v2514_v50 = vadd.f32 %v2513_v4, %v2413_v17  ;;  %v2553_v0 = vmul.f32 %v2413_v17, %v2413_v17 }
 0x230   : > { %v2236_v12 = vpop.f32.mrf.mxu2 }
 0x231   : > { %v2584_v10 = vadd.f32 %v2583_v63, %v2553_v0  ;;  %v2237_v3 = vadd.f32 %v2236_v12, %v2148_v55  ;;  %v2325_v20 = vpop.f32.mrf.mxu3  ;;  %v4872_v12 = vld [vmem:[#allocation40_spill] sm:$0xff] }
 0x232   : > { %v2150_v47 = vpop.f32.mrf.mxu1 }
 0x233   : > { %v2326_v40 = vadd.f32 %v2325_v20, %v2237_v3  ;;  %v2151_v54 = vadd.f32 %v2150_v47, %v4394_v33  ;;  %v4622_v20 = vld [vmem:[%s3582_s5 + $0xcc] sm:$0xf] }
 0x234   : > { %v2417_v44 = vpop.f32.mrf.mxu0 }
 0x235   : > { %v2415_v46 = vadd.f32 %v2414_v11, %v2326_v40  ;;  %2189 = vmatmul.bf16.gmra.mxu1 %v4400_v51  ;;  %2278 = vmatmul.bf16.gmra.mxu2 %v4412_v8 }
 0x236   : > { %2367 = vmatmul.bf16.gmra.mxu3 %v4403_v23 }
 0x237   : > { %2456 = vmatmul.bf16.gmra.mxu0 %v4442_v15  ;;  %2484 = vst [vmem:[%s4579_s23 + $0x38] sm:$0xff] %v2415_v46  ;;  %v2515_v52 = vadd.f32 %v2514_v50, %v2415_v46  ;;  %v2554_v26 = vmul.f32 %v2415_v46, %v2415_v46  ;;  %v845_v50 = vrot.slane %v4422_v45, 5  ;;  %v4628_v46 = vld [vmem:[%s3582_s5 + $0xd0] sm:$0xf] }
 0x238   : > { %v2239_v57 = vpop.f32.mrf.mxu2 }
 0x239   : > { %v2585_v4 = vadd.f32 %v2584_v10, %v2554_v26  ;;  %v2240_v38 = vadd.f32 %v2239_v57, %v2151_v54  ;;  %v2328_v56 = vpop.f32.mrf.mxu3  ;;  %v2804_v10 = vrot.slane %v4872_v12, 9  ;;  %v847_v3 = vrot.slane %v845_v50, 4 }
 0x23a   : > { %v2152_v32 = vpop.f32.mrf.mxu1  ;;  %v851_v26 = vshrl.u32 %v4622_v20, 16  ;;  %v854_v54 = vshll.u32 %v4622_v20, 16 }
 0x23b   : > { %v2329_v60 = vadd.f32 %v2328_v56, %v2240_v38  ;;  %v2153_v23 = vadd.f32 %v2152_v32, %v4871_v30  ;;  %v864_v38 = vshrl.u32 %v4628_v46, 16 }
 0x23c   : > { %v2419_v63 = vpop.f32.mrf.mxu0 }
 0x23d   : > { %v2418_v51 = vadd.f32 %v2417_v44, %v2329_v60  ;;  %v848_v44 = vrot.slane %v4440_v42, 5  ;;  %v846_v42 = vsel %vm3765_vm5, %v2804_v10, %v845_v50 }
 0x23f   : > { %2485 = vst [vmem:[%s4579_s23 + $0x40] sm:$0xff] %v2418_v51  ;;  %v2516_v35 = vadd.f32 %v2515_v52, %v2418_v51  ;;  %v2555_v8 = vmul.f32 %v2418_v51, %v2418_v51  ;;  %v849_v32 = vsel %vm3765_vm5, %v847_v3, %v848_v44  ;;  %v856_v51 = vrot.slane %v854_v54, 5 }
 0x240   : > { %v2241_v36 = vpop.f32.mrf.mxu2 }
 0x241   : > { %v2586_v48 = vadd.f32 %v2585_v4, %v2555_v8  ;;  %v2242_v11 = vadd.f32 %v2241_v36, %v2153_v23  ;;  %v2330_v17 = vpop.f32.mrf.mxu3  ;;  %v860_v4 = vshll.u32 %v4628_v46, 16  ;;  %v1085_v8 = vunpack.c.l.b16 %v849_v32 }
 0x242   : > { %v2155_v33 = vpop.f32.mrf.mxu1  ;;  %v866_v23 = vrot.slane %v864_v38, 4 }
 0x243   : > { %v2331_v0 = vadd.f32 %v2330_v17, %v2242_v11  ;;  %v2156_v40 = vadd.f32 %v2155_v33, %v4436_v16  ;;  %v862_v30 = vrot.slane %v860_v4, 5  ;;  %v265_v17 = vld [vmem:[%s3582_s5 + $0xd4] sm:$0x1] }
 0x244   : > { %v2422_v34 = vpop.f32.mrf.mxu0  ;;  %v882_v4 = vrot.slane %v265_v17, 5 }
 0x245   : > { %v2420_v55 = vadd.f32 %v2419_v63, %v2331_v0  ;;  %2194 = vmatmul.bf16.gmra.mxu1 %v4442_v15  ;;  %2283 = vmatmul.bf16.gmra.mxu2 %v4453_v19  ;;  %v853_v63 = vrot.slane %v851_v26, 4 }
 0x246   : > { %2372 = vmatmul.bf16.gmra.mxu3 %v4444_v6 }
 0x247   : > { %2461 = vmatmul.bf16.gmra.mxu0 %v4471_v9  ;;  %2486 = vst [vmem:[%s4579_s23 + $0x48] sm:$0xff] %v2420_v55  ;;  %v2517_v47 = vadd.f32 %v2516_v35, %v2420_v55  ;;  %v2556_v45 = vmul.f32 %v2420_v55, %v2420_v55  ;;  %v1084_v35 = vunpack.c.l.b16 %v846_v42  ;;  %v857_v12 = vor.u32 %v856_v51, %v853_v63 }
 0x248   : > { %v2244_v15 = vpop.f32.mrf.mxu2 }
 0x249   : > { %v2587_v19 = vadd.f32 %v2586_v48, %v2556_v45  ;;  %v2245_v52 = vadd.f32 %v2244_v15, %v2156_v40  ;;  %v2333_v6 = vpop.f32.mrf.mxu3  ;;  %v1086_v3 = vpack.c.b16 %v1085_v8, %v1084_v35  ;;  %v870_v45 = vshll.u32 %v265_v17, 16 }
 0x24a   : > { %v2157_v57 = vpop.f32.mrf.mxu1  ;;  %v879_v40 = vrot.slane %v4628_v46, 5 }
 0x24b   : > { %v2334_v16 = vadd.f32 %v2333_v6, %v2245_v52  ;;  %v2158_v11 = vadd.f32 %v2157_v57, %v4450_v59  ;;  %v858_v59 = vrot.slane %v857_v12, 4  ;;  %v2805_v6 = vrot.slane %v4622_v20, 9 }
 0x24c   : > { %v2424_v56 = vpop.f32.mrf.mxu0  ;;  %v881_v26 = vrot.slane %v879_v40, 4 }
 0x24d   : > { %v2423_v60 = vadd.f32 %v2422_v34, %v2334_v16  ;;  %v867_v34 = vor.u32 %v866_v23, %v862_v30 }
 0x24f   : > { %2487 = vst [vmem:[%s4579_s23 + $0x50] sm:$0xff] %v2423_v60  ;;  %v2518_v36 = vadd.f32 %v2517_v47, %v2423_v60  ;;  %v2557_v48 = vmul.f32 %v2423_v60, %v2423_v60  ;;  %v868_v47 = vrot.slane %v867_v34, 4  ;;  %v880_v60 = vsel %vm3765_vm5, %v2805_v6, %v879_v40 }
 0x250   : > { %v2246_v33 = vpop.f32.mrf.mxu2  ;;  %v1096_v8 = vunpack.c.l.b16 %v880_v60 }
 0x251   : > { %v2588_v0 = vadd.f32 %v2587_v19, %v2557_v48  ;;  %v2247_v55 = vadd.f32 %v2246_v33, %v2158_v11  ;;  %v2335_v50 = vpop.f32.mrf.mxu3  ;;  %v872_v19 = vrot.slane %v870_v45, 5 }
 0x252   : > { %v2160_v10 = vpop.f32.mrf.mxu1 }
 0x253   : > { %v2336_v44 = vadd.f32 %v2335_v50, %v2247_v55  ;;  %v2161_v46 = vadd.f32 %v2160_v10, %v4468_v18  ;;  %v873_v20 = vsel %vm3760_vm4, %v868_v47, %v872_v19  ;;  %v883_v18 = vsel %vm3765_vm5, %v881_v26, %v882_v4 }
 0x254   : > { %v2427_v15 = vpop.f32.mrf.mxu0  ;;  %v1093_v35 = vunpack.c.l.b16 %v873_v20  ;;  %v1097_v23 = vunpack.c.l.b16 %v883_v18 }
 0x255   : > { %v2425_v52 = vadd.f32 %v2424_v56, %v2336_v44  ;;  %2199 = vmatmul.bf16.gmra.mxu1 %v4471_v9  ;;  %2288 = vmatmul.bf16.gmra.mxu2 %v4474_v31 }
 0x256   : > { %2377 = vmatmul.bf16.gmra.mxu3 %v4476_v58  ;;  %v863_v58 = vsel %vm3760_vm4, %v858_v59, %v862_v30  ;;  %v1098_v37 = vpack.c.b16 %v1097_v23, %v1096_v8 }
 0x257   : > { %2466 = vmatmul.bf16.gmra.mxu0 %v1086_v3  ;;  %2488 = vst [vmem:[%s4579_s23 + $0x58] sm:$0xff] %v2425_v52  ;;  %v2519_v54 = vadd.f32 %v2518_v36, %v2425_v52  ;;  %v2558_v57 = vmul.f32 %v2425_v52, %v2425_v52  ;;  %v1092_v51 = vunpack.c.l.b16 %v863_v58 }
 0x258   : > { %v2249_v38 = vpop.f32.mrf.mxu2 }
 0x259   : > { %v2589_v9 = vadd.f32 %v2588_v0, %v2558_v57  ;;  %v2250_v16 = vadd.f32 %v2249_v38, %v2161_v46  ;;  %v2338_v31 = vpop.f32.mrf.mxu3  ;;  %v3188_v0 = vld [vmem:[%s3582_s5 + $0xcc] sm:$0xff]  ;;  %v1094_v50 = vpack.c.b16 %v1093_v35, %v1092_v51  ;;  %s3261_s5 = sshll.u32 %s3524_s19, 8 }
 0x25a   : > { %v2162_v56 = vpop.f32.mrf.mxu1  ;;  %s2637_s29 = scalar_lea.hbm %s4782_s2, %s3261_s5 }
 0x25b   : > { %v2339_v42 = vadd.f32 %v2338_v31, %v2250_v16  ;;  %v2163_v48 = vadd.f32 %v2162_v56, %v4480_v27  ;;  %s2640_s6 = sshll.u32 %s2637_s29, 4  ;;  %s2641_s6 = int_to_ptr.hbm [resolvable:$true] %s2640_s6 }
 0x25c   : > { %v2429_v32 = vpop.f32.mrf.mxu0  ;;  %s3366_s8 = sshra.s32 %s2641_s6, 4  ;;  %s3367_s8 = int_to_ptr.hbm [resolvable:$true] %s3366_s8 }
 0x25d   : > { %v2428_v63 = vadd.f32 %v2427_v15, %v2339_v42  ;;  %s3368_s9 = scalar_lea.hbm %s3367_s8, 256  ;;  %p3373_p0 = scmp.lt.s32.totalorder %s3367_s8, %s4782_s2 }
 0x25e   : > { %p3369_p11 = scmp.ne.s32.totalorder %s3367_s8, %s3368_s9  ;;  %p3374_p1 = scmp.lt.s32.totalorder %s3372_s12, %s3368_s9 }
 0x25f   : > { %2489 = vst [vmem:[%s4579_s23 + $0x60] sm:$0xff] %v2428_v63  ;;  %v2520_v36 = vadd.f32 %v2519_v54, %v2428_v63  ;;  %v2559_v30 = vmul.f32 %v2428_v63, %v2428_v63 }
 0x260   : > { %v2251_v29 = vpop.f32.mrf.mxu2  ;;  %p3370_p12 = pnand %p3369_p11, %p3543_p5  ;;  %p3375_p2 = por %p3374_p1, %p3373_p0 }
 0x261   : > { %v2590_v11 = vadd.f32 %v2589_v9, %v2559_v30  ;;  %v2252_v17 = vadd.f32 %v2251_v29, %v2163_v48  ;;  %v2340_v33 = vpop.f32.mrf.mxu3 }
 0x262   : > { %v2165_v55 = vpop.f32.mrf.mxu1  ;;  %p3371_p13 = pneg %p3370_p12 }
 0x263   : > { %v2341_v12 = vadd.f32 %v2340_v33, %v2252_v17  ;;  %v2166_v40 = vadd.f32 %v2165_v55, %v4485_v22 }
 0x264   : > { %v2432_v10 = vpop.f32.mrf.mxu0  ;;  %p3376_p3 = pnand %p3375_p2, %p3371_p13 }
 0x265   : > { %v2430_v34 = vadd.f32 %v2429_v32, %v2341_v12  ;;  %2204 = vmatmul.bf16.gmra.mxu1 %v1086_v3  ;;  %2293 = vmatmul.bf16.gmra.mxu2 %v3188_v0 }
 0x266   : > { %2382 = vmatmul.bf16.gmra.mxu3 %v1094_v50 }
 0x267   : > { %2471 = vmatmul.bf16.gmra.mxu0 %v1098_v37  ;;  %2490 = vst [vmem:[%s4579_s23 + $0x68] sm:$0xff] %v2430_v34  ;;  %v2521_v45 = vadd.f32 %v2520_v36, %v2430_v34  ;;  %v2560_v27 = vmul.f32 %v2430_v34, %v2430_v34 }
 0x268   : > { %v2254_v44 = vpop.f32.mrf.mxu2 }
 0x269   : > { %v2591_v15 = vadd.f32 %v2590_v11, %v2560_v27  ;;  %v2255_v52 = vadd.f32 %v2254_v44, %v2166_v40  ;;  %v2343_v59 = vpop.f32.mrf.mxu3 }
 0x26a   : > { %v2167_v47 = vpop.f32.mrf.mxu1 }
 0x26b   : > { %v2344_v19 = vadd.f32 %v2343_v59, %v2255_v52  ;;  %v2168_v57 = vadd.f32 %v2167_v47, %v4490_v39 }
 0x26c   : > { %v2434_v6 = vpop.f32.mrf.mxu0 }
 0x26d   : > { %v2433_v26 = vadd.f32 %v2432_v10, %v2344_v19 }
 0x26f   : > { %2491 = vst [vmem:[%s4579_s23 + $0x70] sm:$0xff] %v2433_v26  ;;  %v2522_v3 = vadd.f32 %v2521_v45, %v2433_v26  ;;  %v2561_v54 = vmul.f32 %v2433_v26, %v2433_v26 }
 0x270   : > { %v2256_v46 = vpop.f32.mrf.mxu2 }
 0x271   : > { %v2592_v4 = vadd.f32 %v2591_v15, %v2561_v54  ;;  %v2257_v38 = vadd.f32 %v2256_v46, %v2168_v57  ;;  %v2345_v9 = vpop.f32.mrf.mxu3 }
 0x272   : > { %v2170_v16 = vpop.f32.mrf.mxu1 }
 0x273   : > { %v2346_v22 = vadd.f32 %v2345_v9, %v2257_v38  ;;  %v2171_v32 = vadd.f32 %v2170_v16, %v4495_v7 }
 0x274   : > { %v2437_v31 = vpop.f32.mrf.mxu0 }
 0x275   : > { %v2435_v56 = vadd.f32 %v2434_v6, %v2346_v22 }
 0x277   : > { %2492 = vst [vmem:[%s4579_s23 + $0x78] sm:$0xff] %v2435_v56  ;;  %v2523_v58 = vadd.f32 %v2522_v3, %v2435_v56  ;;  %v2562_v42 = vmul.f32 %v2435_v56, %v2435_v56 }
 0x278   : > { %v2259_v20 = vpop.f32.mrf.mxu2 }
 0x279   : > { %v2593_v60 = vadd.f32 %v2592_v4, %v2562_v42  ;;  %v2260_v18 = vadd.f32 %v2259_v20, %v2171_v32  ;;  %v2348_v63 = vpop.f32.mrf.mxu3 }
 0x27a   : > { %v2172_v51 = vpop.f32.mrf.mxu1 }
 0x27b   : > { %v2349_v39 = vadd.f32 %v2348_v63, %v2260_v18  ;;  %v2173_v30 = vadd.f32 %v2172_v51, %v4500_v25 }
 0x27c   : > { %v2439_v35 = vpop.f32.mrf.mxu0 }
 0x27d   : > { %v2438_v8 = vadd.f32 %v2437_v31, %v2349_v39 }
 0x27f   : > { %2493 = vst [vmem:[%s4579_s23 + $0x80] sm:$0xff] %v2438_v8  ;;  %v2524_v23 = vadd.f32 %v2523_v58, %v2438_v8  ;;  %v2563_v36 = vmul.f32 %v2438_v8, %v2438_v8 }
 0x280   : > { %v2261_v48 = vpop.f32.mrf.mxu2 }
 0x281   : > { %v2594_v29 = vadd.f32 %v2593_v60, %v2563_v36  ;;  %v2262_v11 = vadd.f32 %v2261_v48, %v2173_v30  ;;  %v2350_v17 = vpop.f32.mrf.mxu3 }
 0x282   : > { %v2175_v33 = vpop.f32.mrf.mxu1 }
 0x283   : > { %v2351_v7 = vadd.f32 %v2350_v17, %v2262_v11  ;;  %v2176_v12 = vadd.f32 %v2175_v33, %v4505_v1 }
 0x284   : > { %v2442_v0 = vpop.f32.mrf.mxu0 }
 0x285   : > { %v2440_v55 = vadd.f32 %v2439_v35, %v2351_v7 }
 0x287   : > { %2494 = vst [vmem:[%s4579_s23 + $0x88] sm:$0xff] %v2440_v55  ;;  %v2525_v50 = vadd.f32 %v2524_v23, %v2440_v55  ;;  %v2564_v37 = vmul.f32 %v2440_v55, %v2440_v55 }
 0x288   : > { %v2264_v10 = vpop.f32.mrf.mxu2 }
 0x289   : > { %v2595_v34 = vadd.f32 %v2594_v29, %v2564_v37  ;;  %v2265_v45 = vadd.f32 %v2264_v10, %v2176_v12  ;;  %v2353_v27 = vpop.f32.mrf.mxu3 }
 0x28a   : > { %v2177_v40 = vpop.f32.mrf.mxu1 }
 0x28b   : > { %v2354_v25 = vadd.f32 %v2353_v27, %v2265_v45  ;;  %v2178_v47 = vadd.f32 %v2177_v40, %v4510_v5 }
 0x28c   : > { %v2444_v44 = vpop.f32.mrf.mxu0 }
 0x28d   : > { %v2443_v15 = vadd.f32 %v2442_v0, %v2354_v25 }
 0x28f   : > { %2495 = vst [vmem:[%s4579_s23 + $0x90] sm:$0xff] %v2443_v15  ;;  %v2526_v52 = vadd.f32 %v2525_v50, %v2443_v15  ;;  %v2565_v59 = vmul.f32 %v2443_v15, %v2443_v15 }
 0x290   : > { %v2266_v19 = vpop.f32.mrf.mxu2 }
 0x291   : > { %v2596_v6 = vadd.f32 %v2595_v34, %v2565_v59  ;;  %v2267_v26 = vadd.f32 %v2266_v19, %v2178_v47  ;;  %v2355_v3 = vpop.f32.mrf.mxu3 }
 0x292   : > { %v2180_v54 = vpop.f32.mrf.mxu1 }
 0x293   : > { %v2356_v1 = vadd.f32 %v2355_v3, %v2267_v26  ;;  %v2181_v9 = vadd.f32 %v2180_v54, %v4515_v14 }
 0x294   : > { %v2447_v57 = vpop.f32.mrf.mxu0 }
 0x295   : > { %v2445_v46 = vadd.f32 %v2444_v44, %v2356_v1 }
 0x297   : > { %2496 = vst [vmem:[%s4579_s23 + $0x98] sm:$0xff] %v2445_v46  ;;  %v2527_v4 = vadd.f32 %v2526_v52, %v2445_v46  ;;  %v2566_v38 = vmul.f32 %v2445_v46, %v2445_v46 }
 0x298   : > { %v2269_v16 = vpop.f32.mrf.mxu2 }
 0x299   : > { %v2597_v22 = vadd.f32 %v2596_v6, %v2566_v38  ;;  %v2270_v31 = vadd.f32 %v2269_v16, %v2181_v9  ;;  %v2358_v56 = vpop.f32.mrf.mxu3 }
 0x29a   : > { %v2182_v58 = vpop.f32.mrf.mxu1 }
 0x29b   : > { %v2359_v5 = vadd.f32 %v2358_v56, %v2270_v31  ;;  %v2183_v18 = vadd.f32 %v2182_v58, %v4520_v13 }
 0x29c   : > { %v2449_v42 = vpop.f32.mrf.mxu0 }
 0x29d   : > { %v2448_v32 = vadd.f32 %v2447_v57, %v2359_v5 }
 0x29f   : > { %2497 = vst [vmem:[%s4579_s23 + $0xa0] sm:$0xff] %v2448_v32  ;;  %v2528_v20 = vadd.f32 %v2527_v4, %v2448_v32  ;;  %v2567_v60 = vmul.f32 %v2448_v32, %v2448_v32 }
 0x2a0   : > { %v2271_v63 = vpop.f32.mrf.mxu2 }
 0x2a1   : > { %v2598_v51 = vadd.f32 %v2597_v22, %v2567_v60  ;;  %v2272_v39 = vadd.f32 %v2271_v63, %v2183_v18  ;;  %v2360_v35 = vpop.f32.mrf.mxu3 }
 0x2a2   : > { %v2185_v8 = vpop.f32.mrf.mxu1 }
 0x2a3   : > { %v2361_v14 = vadd.f32 %v2360_v35, %v2272_v39  ;;  %v2186_v29 = vadd.f32 %v2185_v8, %v4525_v53 }
 0x2a4   : > { %v2452_v23 = vpop.f32.mrf.mxu0 }
 0x2a5   : > { %v2450_v36 = vadd.f32 %v2449_v42, %v2361_v14 }
 0x2a7   : > { %2498 = vst [vmem:[%s4579_s23 + $0xa8] sm:$0xff] %v2450_v36  ;;  %v2529_v30 = vadd.f32 %v2528_v20, %v2450_v36  ;;  %v2568_v48 = vmul.f32 %v2450_v36, %v2450_v36 }
 0x2a8   : > { %v2274_v11 = vpop.f32.mrf.mxu2 }
 0x2a9   : > { %v2599_v17 = vadd.f32 %v2598_v51, %v2568_v48  ;;  %v2275_v33 = vadd.f32 %v2274_v11, %v2186_v29  ;;  %v2363_v7 = vpop.f32.mrf.mxu3 }
 0x2aa   : > { %v2187_v0 = vpop.f32.mrf.mxu1 }
 0x2ab   : > { %v2364_v13 = vadd.f32 %v2363_v7, %v2275_v33  ;;  %v2188_v10 = vadd.f32 %v2187_v0, %v4530_v61 }
 0x2ac   : > { %v2454_v55 = vpop.f32.mrf.mxu0 }
 0x2ad   : > { %v2453_v50 = vadd.f32 %v2452_v23, %v2364_v13 }
 0x2af   : > { %2499 = vst [vmem:[%s4579_s23 + $0xb0] sm:$0xff] %v2453_v50  ;;  %v2530_v37 = vadd.f32 %v2529_v30, %v2453_v50  ;;  %v2569_v12 = vmul.f32 %v2453_v50, %v2453_v50 }
 0x2b0   : > { %v2276_v34 = vpop.f32.mrf.mxu2 }
 0x2b1   : > { %v2600_v45 = vadd.f32 %v2599_v17, %v2569_v12  ;;  %v2277_v27 = vadd.f32 %v2276_v34, %v2188_v10  ;;  %v2365_v40 = vpop.f32.mrf.mxu3 }
 0x2b2   : > { %v2190_v25 = vpop.f32.mrf.mxu1 }
 0x2b3   : > { %v2366_v53 = vadd.f32 %v2365_v40, %v2277_v27  ;;  %v2191_v47 = vadd.f32 %v2190_v25, %v4535_v2 }
 0x2b4   : > { %v2457_v44 = vpop.f32.mrf.mxu0 }
 0x2b5   : > { %v2455_v15 = vadd.f32 %v2454_v55, %v2366_v53 }
 0x2b7   : > { %2500 = vst [vmem:[%s4579_s23 + $0xb8] sm:$0xff] %v2455_v15  ;;  %v2531_v52 = vadd.f32 %v2530_v37, %v2455_v15  ;;  %v2570_v59 = vmul.f32 %v2455_v15, %v2455_v15 }
 0x2b8   : > { %v2279_v19 = vpop.f32.mrf.mxu2 }
 0x2b9   : > { %v2601_v6 = vadd.f32 %v2600_v45, %v2570_v59  ;;  %v2280_v26 = vadd.f32 %v2279_v19, %v2191_v47  ;;  %v2368_v3 = vpop.f32.mrf.mxu3 }
 0x2ba   : > { %v2192_v54 = vpop.f32.mrf.mxu1 }
 0x2bb   : > { %v2369_v61 = vadd.f32 %v2368_v3, %v2280_v26  ;;  %v2193_v38 = vadd.f32 %v2192_v54, %v4540_v21 }
 0x2bc   : > { %v2459_v1 = vpop.f32.mrf.mxu0 }
 0x2bd   : > { %v2458_v57 = vadd.f32 %v2457_v44, %v2369_v61 }
 0x2bf   : > { %2501 = vst [vmem:[%s4579_s23 + $0xc0] sm:$0xff] %v2458_v57  ;;  %v2532_v46 = vadd.f32 %v2531_v52, %v2458_v57  ;;  %v2571_v4 = vmul.f32 %v2458_v57, %v2458_v57 }
 0x2c0   : > { %v2281_v9 = vpop.f32.mrf.mxu2 }
 0x2c1   : > { %v2602_v16 = vadd.f32 %v2601_v6, %v2571_v4  ;;  %v2282_v22 = vadd.f32 %v2281_v9, %v2193_v38  ;;  %v2370_v31 = vpop.f32.mrf.mxu3 }
 0x2c2   : > { %v2195_v56 = vpop.f32.mrf.mxu1 }
 0x2c3   : > { %v2371_v2 = vadd.f32 %v2370_v31, %v2282_v22  ;;  %v2196_v20 = vadd.f32 %v2195_v56, %v4545_v28 }
 0x2c4   : > { %v2462_v58 = vpop.f32.mrf.mxu0 }
 0x2c5   : > { %v2460_v5 = vadd.f32 %v2459_v1, %v2371_v2 }
 0x2c7   : > { %2502 = vst [vmem:[%s4579_s23 + $0xc8] sm:$0xff] %v2460_v5  ;;  %v2533_v42 = vadd.f32 %v2532_v46, %v2460_v5  ;;  %v2572_v32 = vmul.f32 %v2460_v5, %v2460_v5 }
 0x2c8   : > { %v2284_v60 = vpop.f32.mrf.mxu2 }
 0x2c9   : > { %v2603_v18 = vadd.f32 %v2602_v16, %v2572_v32  ;;  %v2285_v63 = vadd.f32 %v2284_v60, %v2196_v20  ;;  %v2373_v51 = vpop.f32.mrf.mxu3 }
 0x2ca   : > { %v2197_v39 = vpop.f32.mrf.mxu1 }
 0x2cb   : > { %v2374_v21 = vadd.f32 %v2373_v51, %v2285_v63  ;;  %v2198_v36 = vadd.f32 %v2197_v39, %v4550_v43 }
 0x2cc   : > { %v2464_v35 = vpop.f32.mrf.mxu0 }
 0x2cd   : > { %v2463_v8 = vadd.f32 %v2462_v58, %v2374_v21 }
 0x2cf   : > { %2503 = vst [vmem:[%s4579_s23 + $0xd0] sm:$0xff] %v2463_v8  ;;  %v2534_v14 = vadd.f32 %v2533_v42, %v2463_v8  ;;  %v2573_v23 = vmul.f32 %v2463_v8, %v2463_v8 }
 0x2d0   : > { %v2286_v30 = vpop.f32.mrf.mxu2 }
 0x2d1   : > { %v2604_v48 = vadd.f32 %v2603_v18, %v2573_v23  ;;  %v2287_v29 = vadd.f32 %v2286_v30, %v2198_v36  ;;  %v2375_v11 = vpop.f32.mrf.mxu3 }
 0x2d2   : > { %v2200_v28 = vpop.f32.mrf.mxu1 }
 0x2d3   : > { %v2376_v17 = vadd.f32 %v2375_v11, %v2287_v29  ;;  %v2201_v55 = vadd.f32 %v2200_v28, %v4555_v49 }
 0x2d4   : > { %v2467_v7 = vpop.f32.mrf.mxu0 }
 0x2d5   : > { %v2465_v33 = vadd.f32 %v2464_v35, %v2376_v17 }
 0x2d7   : > { %2504 = vst [vmem:[%s4579_s23 + $0xd8] sm:$0xff] %v2465_v33  ;;  %v2535_v0 = vadd.f32 %v2534_v14, %v2465_v33  ;;  %v2574_v13 = vmul.f32 %v2465_v33, %v2465_v33 }
 0x2d8   : > { %v2289_v50 = vpop.f32.mrf.mxu2 }
 0x2d9   : > { %v2605_v37 = vadd.f32 %v2604_v48, %v2574_v13  ;;  %v2290_v12 = vadd.f32 %v2289_v50, %v2201_v55  ;;  %v2378_v10 = vpop.f32.mrf.mxu3 }
 0x2da   : > { %v2202_v43 = vpop.f32.mrf.mxu1 }
 0x2db   : > { %v2379_v34 = vadd.f32 %v2378_v10, %v2290_v12  ;;  %v2203_v25 = vadd.f32 %v2202_v43, %v4560_v24 }
 0x2dc   : > { %v2469_v53 = vpop.f32.mrf.mxu0 }
 0x2dd   : > { %v2468_v45 = vadd.f32 %v2467_v7, %v2379_v34 }
 0x2df   : > { %2505 = vst [vmem:[%s4579_s23 + $0xe0] sm:$0xff] %v2468_v45  ;;  %v2536_v27 = vadd.f32 %v2535_v0, %v2468_v45  ;;  %v2575_v40 = vmul.f32 %v2468_v45, %v2468_v45 }
 0x2e0   : > { %v2291_v44 = vpop.f32.mrf.mxu2 }
 0x2e1   : > { %v2606_v15 = vadd.f32 %v2605_v37, %v2575_v40  ;;  %v2292_v52 = vadd.f32 %v2291_v44, %v2203_v25  ;;  %v2380_v59 = vpop.f32.mrf.mxu3 }
 0x2e2   : > { %v2205_v49 = vpop.f32.mrf.mxu1 }
 0x2e3   : > { %v2381_v47 = vadd.f32 %v2380_v59, %v2292_v52  ;;  %v2206_v3 = vadd.f32 %v2205_v49, %v4565_v41 }
 0x2e4   : > { %v2472_v57 = vpop.f32.mrf.mxu0 }
 0x2e5   : > { %v2470_v19 = vadd.f32 %v2469_v53, %v2381_v47 }
 0x2e7   : > { %2506 = vst [vmem:[%s4579_s23 + $0xe8] sm:$0xff] %v2470_v19  ;;  %v2537_v6 = vadd.f32 %v2536_v27, %v2470_v19  ;;  %v2576_v26 = vmul.f32 %v2470_v19, %v2470_v19 }
 0x2e8   : > { %v2294_v54 = vpop.f32.mrf.mxu2 }
 0x2e9   : > { %v2607_v61 = vadd.f32 %v2606_v15, %v2576_v26  ;;  %v2295_v1 = vadd.f32 %v2294_v54, %v2206_v3  ;;  %v2383_v24 = vpop.f32.mrf.mxu3 }
 0x2ea   : > { %v2207_v4 = vpop.f32.mrf.mxu1 }
 0x2eb   : > { %v2384_v46 = vadd.f32 %v2383_v24, %v2295_v1  ;;  %v2208_v22 = vadd.f32 %v2207_v4, %v4570_v62 }
 0x2ec   : > { %v2474_v5 = vpop.f32.mrf.mxu0 }
 0x2ed   : > { %v2473_v38 = vadd.f32 %v2472_v57, %v2384_v46 }
 0x2ef   : > { %2507 = vst [vmem:[%s4579_s23 + $0xf0] sm:$0xff] %v2473_v38  ;;  %v2538_v9 = vadd.f32 %v2537_v6, %v2473_v38  ;;  %v2577_v16 = vmul.f32 %v2473_v38, %v2473_v38 }
 0x2f0   : > { %v2296_v41 = vpop.f32.mrf.mxu2 }
 0x2f1   : > { %v2608_v31 = vadd.f32 %v2607_v61, %v2577_v16  ;;  %v2297_v56 = vadd.f32 %v2296_v41, %v2208_v22  ;;  %v2385_v2 = vpop.f32.mrf.mxu3 }
 0x2f3   : > { %v2386_v58 = vadd.f32 %v2385_v2, %v2297_v56 }
 0x2f5   : > { %v2475_v42 = vadd.f32 %v2474_v5, %v2386_v58 }
 0x2f7   : > { %2508 = vst [vmem:[%s4579_s23 + $0xf8] sm:$0xff] %v2475_v42  ;;  %v2539_v32 = vadd.f32 %v2538_v9, %v2475_v42  ;;  %v2578_v62 = vmul.f32 %v2475_v42, %v2475_v42 }
 0x2f8   : > { %3379 = shalt.err (!%p3376_p3)
}
 0x2f9   : > { %s3476_s23 = smov 128   ;;  %s3477_s5 = smov 8   ;;  %v2540_v20 = vrot.slane %v2539_v32, 4  ;;  %v2609_v60 = vadd.f32 %v2608_v31, %v2578_v62 }
 0x2fa   : > { %3287 = dma.vmem_to_hbm [thread:$0]  (%p3543_p5), %s2639_s30, 4096, %s2641_s6, %s2618_s7, %s3476_s23, %s3476_s23, %s3477_s5  }
 0x2fb   : > { %v2541_v18 = vadd.f32 %v2540_v20, %v2539_v32  ;;  %v2610_v63 = vrot.slane %v2609_v60, 4  ;;  %s2652_s29 = scalar_lea.hbm %s4783_s3, %s3524_s19  ;;  %s2622_s8 = sand.u32 1, %s3524_s19  }
 0x2fc   : > { %s2665_s11 = scalar_lea.hbm %s4784_s4, %s3524_s19  ;;  %s200_s12 = scalar_lea.vmem [#allocation4], %s4575_s14 }
 0x2fd   : > { %v2611_v51 = vadd.f32 %v2610_v63, %v2609_v60  ;;  %v2542_v39 = vrot.slane %v2541_v18, 2  ;;  %s4722_s30 = sshll.u32 %s200_s12, 4  ;;  %s4724_s6 = sshll.u32 %s2652_s29, 4  ;;  %s2655_s30 = int_to_ptr.vmem [resolvable:$true] %s4722_s30  ;;  %s2657_s6 = int_to_ptr.hbm [resolvable:$true] %s4724_s6 }
 0x2fe   : > { %s206_s7 = scalar_lea.vmem [#allocation6], %s4575_s14  ;;  %s4729_s22 = sshll.u32 %s2665_s11, 4  ;;  %s2670_s22 = int_to_ptr.hbm [resolvable:$true] %s4729_s22 }
 0x2ff   : > { %v2543_v21 = vadd.f32 %v2542_v39, %v2541_v18  ;;  %v2612_v35 = vrot.slane %v2611_v51, 2  ;;  %s4727_s13 = sshll.u32 %s206_s7, 4  ;;  %s2623_s19 = scalar_lea.sflag [#allocation5], %s2622_s8  ;;  %s2668_s13 = int_to_ptr.vmem [resolvable:$true] %s4727_s13 }
 0x300   : > { %s3394_s23 = sshra.s32 %s2657_s6, 4  ;;  %s3400_s28 = scalar_lea.hbm %s4783_s3, 2  ;;  %s3395_s23 = int_to_ptr.hbm [resolvable:$true] %s3394_s23 }
 0x301   : > { %v2544_v8 = vrot.slane %v2543_v21, 1  ;;  %v2613_v14 = vadd.f32 %v2612_v35, %v2611_v51  ;;  %s3396_s5 = scalar_lea.hbm %s3395_s23, 1  ;;  %p3401_p9 = scmp.lt.s32.totalorder %s3395_s23, %s4783_s3 }
 0x302   : > { %p3397_p4 = scmp.ne.s32.totalorder %s3395_s23, %s3396_s5  ;;  %p3402_p10 = scmp.lt.s32.totalorder %s3400_s28, %s3396_s5 }
 0x303   : > { %v2545_v23 = vadd.f32 %v2544_v8, %v2543_v21  ;;  %v2614_v36 = vrot.slane %v2613_v14, 1 }
 0x304   : > { %p3398_p7 = pnand %p3397_p4, %p3543_p5  ;;  %p3403_p11 = por %p3402_p10, %p3401_p9 }
 0x305   : > { %2546 = vst [vmem:[%s200_s12] sm:$0x1] %v2545_v23  ;;  %v2615_v30 = vadd.f32 %v2614_v36, %v2613_v14 }
 0x306   : > { %p3399_p8 = pneg %p3398_p7 }
 0x308   : > { %p3404_p12 = pnand %p3403_p11, %p3399_p8 }
 0x30a   : > { %3407 = shalt.err (!%p3404_p12)
}
 0x30b   : > { %3288 = dma.vmem_to_hbm [thread:$0]  (%p3543_p5), %s2655_s30, 16, %s2657_s6, %s2623_s19   ;;  %2616 = vst [vmem:[%s206_s7] sm:$0x1] %v2615_v30 }
 0x30c   : > { %s3422_s8 = sshra.s32 %s2670_s22, 4  ;;  %s3428_s23 = scalar_lea.hbm %s4784_s4, 2  ;;  %s3423_s8 = int_to_ptr.hbm [resolvable:$true] %s3422_s8 }
 0x30d   : > { %s3424_s10 = scalar_lea.hbm %s3423_s8, 1  ;;  %p3429_p2 = scmp.lt.s32.totalorder %s3423_s8, %s4784_s4 }
 0x30e   : > { %p3425_p13 = scmp.ne.s32.totalorder %s3423_s8, %s3424_s10  ;;  %p3430_p3 = scmp.lt.s32.totalorder %s3428_s23, %s3424_s10 }
 0x310   : > { %p3426_p0 = pnand %p3425_p13, %p3543_p5  ;;  %p3431_p4 = por %p3430_p3, %p3429_p2 }
 0x312   : > { %p3427_p1 = pneg %p3426_p0 }
 0x314   : > { %p3432_p7 = pnand %p3431_p4, %p3427_p1 }
 0x316   : > { %3435 = shalt.err (!%p3432_p7)
}
 0x317   : > { %3289 = dma.vmem_to_hbm [thread:$0]  (%p3543_p5), %s2668_s13, 16, %s2670_s22, %s2623_s19  }
 0x318 PF: > { %p3303_p8 = scmp.ge.s32.totalorder %s3474_s18, 2  ;;  %s2681_s30 = sand.u32 1, %s3462_s15  }
 0x319   : > { %s2682_s6 = scalar_lea.sflag [#allocation3], %s2681_s30 }
 0x31a   : > { %p3294_p9 = pnand %p3303_p8, %p3547_p6 }
 0x31c   : > { %p3295_p10 = pneg %p3294_p9 }
 0x31e   : > { %3453 = dma.done.wait (%p3295_p10), %s2682_s6, 4096  }
 0x31f   : > { %3455 = vsyncadd (%p3295_p10), %s2682_s6, 4294963200  ;;  %s2691_s25 = sand.u32 1, %s2782_s20  }
 0x320   : > { %s2692_s7 = scalar_lea.sflag [#allocation5], %s2691_s25 }
 0x321   : > { %3457 = dma.done.wait (%p3295_p10), %s2692_s7, 32  }
 0x322   : > { %3459 = vsyncadd (%p3295_p10), %s2692_s7, 4294967264  ;;  %p18_p5 = scmp.ge.s32.totalorder %s3528_s21, 4   ;;  %s4873_s15 = smov %s3466_s16 }
 0x323   : > { %s4874_s16 = smov %s3470_s17  ;;  %s4875_s17 = smov %s3541_s24 }
 0x324   : > { %s4876_s18 = smov %s3528_s21  ;;  %20 = sbr.rel (!%p18_p5) target bundleno = 5 (0x5), region = 95 }
 0x329   :  { %2706 = vsyncpa [#allocation3], 1 }
 0x32a   :  { %2708 = vsyncpa [#allocation3 + $0x1], 1 }
 0x32b   :  { %2709 = vsyncpa [#allocation5], 1 }
 0x32c   :  { %2711 = vsyncpa [#allocation5 + $0x1], 1 }

</bundles_post_ra>
